<compile_context>
chip_gen: v6e
topology: v6e:2x2x1
jax: 0.10.0
libtpu: 0.0.40
codegen_flags: <defaults>
</compile_context>

<pallas_src>
import functools
import math

import jax
import jax.numpy as jnp
from jax.experimental import pallas as pl
from jax.experimental.pallas import tpu as pltpu


# --------------------------------------------------------------------------- #
# Kernels
# --------------------------------------------------------------------------- #
def _downblock_kernel_strided(x_ref, o_ref, *, scale, w, flat_out):
    """Fused (s1, s2) extraction via a single strided lane read per group.

    x_ref block: (1, tc, th, scale*w)
    o_ref block: (1, scale*scale, tc, th*wo)   if flat_out
                 (1, scale*scale, tc, th, wo)  otherwise
    """
    tc = x_ref.shape[1]
    th = x_ref.shape[2]
    wo = w // scale
    for s1 in range(scale):           # static: `scale` is compile-time constant
        for s2 in range(scale):
            g = s1 * scale + s2
            # out[g, ch, i, j] = xr[ch, i, s1*w + j*scale + s2]
            val = x_ref[0, :, :, pl.ds(s1 * w + s2, wo, stride=scale)]
            if flat_out:
                o_ref[0, g, :, :] = val.reshape(tc, th * wo)
            else:
                o_ref[0, g, :, :, :] = val


def _downblock_kernel_reshape(x_ref, o_ref, *, scale, w, flat_out):
    """Fallback: contiguous lane slice per s1, then lane-split reshape + select."""
    tc = x_ref.shape[1]
    th = x_ref.shape[2]
    wo = w // scale
    for s1 in range(scale):
        rows = x_ref[0, :, :, s1 * w:(s1 + 1) * w]          # (tc, th, w) contiguous
        r4 = rows.reshape(tc, th, wo, scale)
        for s2 in range(scale):
            val = r4[:, :, :, s2]
            if flat_out:
                o_ref[0, s1 * scale + s2, :, :] = val.reshape(tc, th * wo)
            else:
                o_ref[0, s1 * scale + s2, :, :, :] = val


# --------------------------------------------------------------------------- #
# Tile selection
# --------------------------------------------------------------------------- #
def _lcm(a, b):
    return a * b // math.gcd(a, b)


def _sublane_align(itemsize):
    # f32 -> 8, bf16 -> 16, int8/fp8 -> 32 (sub-32-bit dtypes pack along sublanes).
    return 8 * max(1, 4 // itemsize)


def _pick_tile(extent, limit, align):
    """Divisor of `extent` that is a multiple of `align`, as close to (and at
    most) `limit` as possible; else the smallest such divisor; else `extent`
    (a full-extent block dim is always layout-legal)."""
    limit = max(1, min(limit, extent))
    for d in range(limit, 0, -1):
        if extent % d == 0 and d % align == 0:
            return d
    for d in range(limit + 1, extent + 1):
        if extent % d == 0 and d % align == 0:
            return d
    return extent


def _choose_tiles(c, ho, wo, scale, w, itemsize, target_block_bytes, flat_out,
                  vmem_budget_bytes):
    sub = _sublane_align(itemsize)
    # th is the second-minor dim of the input block (and, if flat_out, controls
    # lane-density of the output block: need th*wo % 128 == 0 unless th == ho).
    th_align = _lcm(sub, 128 // math.gcd(wo, 128)) if flat_out else sub
    # tc is the second-minor dim of the flattened output block.
    tc_align = sub if flat_out else 1

    row_bytes = scale * w * itemsize
    target = max(row_bytes, target_block_bytes)

    def tiles_for(tgt):
        th = _pick_tile(ho, max(1, tgt // row_bytes), th_align)
        tc = _pick_tile(c, max(1, tgt // (row_bytes * th)), tc_align)
        return tc, th

    while True:
        tc, th = tiles_for(target)
        block_bytes = tc * th * scale * w * itemsize   # out block == in block size
        footprint = 4 * block_bytes                    # 2-deep buffering of in + out
        if footprint <= vmem_budget_bytes or target <= row_bytes:
            break
        target //= 2
    return tc, th, footprint


# --------------------------------------------------------------------------- #
# Wrapper
# --------------------------------------------------------------------------- #
def down_block(x, scale, *, target_block_bytes=2 << 20):
    """Pallas implementation of DownBlock.forward (NCHW in, NCHW out).

    target_block_bytes: per-block DMA granularity. ~2 MiB is a good universal
    default; raise to ~4 MiB on v7x/v6e (amortises the ~0.35 us per-grid-step
    overhead), keep 1-2 MiB on v5e. Best performance when w % 128 == 0.
    """
    n, c, h, w = x.shape
    assert h % scale == 0 and w % scale == 0, "spatial dims must be divisible by scale"
    ho, wo = h // scale, w // scale
    s2tot = scale * scale
    itemsize = jnp.dtype(x.dtype).itemsize

    # Free reshape (adjacent-dim split/merge): xr[n,ch,i,s1*w + j] == x[n,ch,i*scale+s1,j]
    xr = x.reshape(n, c, ho, scale * w)

    # Lane-dense output layout when wo would give masked / tiny stores.
    flat_out = (wo % 128 != 0) or (wo * itemsize < 512)

    vmem_limit = 48 * 1024 * 1024
    tc, th, footprint = _choose_tiles(
        c, ho, wo, scale, w, itemsize, target_block_bytes, flat_out,
        vmem_budget_bytes=40 << 20)
    assert footprint + (4 << 20) <= vmem_limit, (
        f"DownBlock tile selection exceeds VMEM budget: footprint={footprint} bytes "
        f"(tc={tc}, th={th}); reduce target_block_bytes")

    grid = (n, c // tc, ho // th)

    if flat_out:
        out_shape = jax.ShapeDtypeStruct((n, s2tot, c, ho * wo), x.dtype)
        out_spec = pl.BlockSpec((1, s2tot, tc, th * wo),
                                lambda b, ci, ti: (b, 0, ci, ti))
    else:
        out_shape = jax.ShapeDtypeStruct((n, s2tot, c, ho, wo), x.dtype)
        out_spec = pl.BlockSpec((1, s2tot, tc, th, wo),
                                lambda b, ci, ti: (b, 0, ci, ti, 0))

    in_spec = pl.BlockSpec((1, tc, th, scale * w),
                           lambda b, ci, ti: (b, ci, ti, 0))

    cost = pl.CostEstimate(flops=0, transcendentals=0,
                           bytes_accessed=2 * x.size * itemsize)

    def build(use_strided):
        body = _downblock_kernel_strided if use_strided else _downblock_kernel_reshape
        kernel = functools.partial(body, scale=scale, w=w, flat_out=flat_out)
        return pl.pallas_call(
            kernel,
            out_shape=out_shape,
            grid=grid,
            in_specs=[in_spec],
            out_specs=out_spec,
            compiler_params=pltpu.CompilerParams(
                # Every grid step writes a disjoint output block -> fully parallel.
                dimension_semantics=("parallel", "parallel", "parallel"),
                vmem_limit_bytes=vmem_limit,
            ),
            cost_estimate=cost,
        )

    try:
        o = build(use_strided=True)(xr)
    except Exception:
        # Fallback if strided lane reads do not lower on this toolchain;
        # semantically identical (lane slice + reshape + select).
        o = build(use_strided=False)(xr)

    # Free reshape merging adjacent dims: channel = (s1*scale + s2)*c + ch,
    # exactly the PyTorch permute(0,3,5,1,2,4) ordering.
    return o.reshape(n, c * s2tot, ho, wo)


def down_block_reference(x, scale):
    """Pure-JAX reference matching the PyTorch forward exactly."""
    n, c, h, w = x.shape
    y = x.reshape(n, c, h // scale, scale, w // scale, scale)
    y = jnp.transpose(y, (0, 3, 5, 1, 2, 4))
    return y.reshape(n, c * scale * scale, h // scale, w // scale)


if __name__ == "__main__":
    key = jax.random.PRNGKey(0)

    # Small NCHW input consistent with the module's forward: n=2, c=4, h=w=16.
    scale = 2
    x = jax.random.normal(key, (2, 4, 16, 16), dtype=jnp.float32)

    out = jax.block_until_ready(down_block(x, scale))
    ref = down_block_reference(x, scale)

    assert out.shape == (2, 4 * scale * scale, 16 // scale, 16 // scale), out.shape
    assert out.dtype == x.dtype
    assert jnp.array_equal(out, ref), "Pallas DownBlock mismatch vs reference"

    # Second check with a tiny block budget to force a multi-step grid
    # (exercises the c/ho tiling, lane-dense output blocks, and index maps).
    x2 = jax.random.normal(jax.random.PRNGKey(1), (2, 8, 64, 32), dtype=jnp.float32)
    out2 = jax.block_until_ready(down_block(x2, scale, target_block_bytes=4096))
    ref2 = down_block_reference(x2, scale)
    assert out2.shape == ref2.shape
    assert jnp.array_equal(out2, ref2), "Pallas DownBlock (tiled) mismatch vs reference"

    print("KERNEL_OK")
</pallas_src>

<mosaic_0001>
module attributes {stable_mosaic.version = 11 : i64} {
  func.func @_downblock_kernel_strided(%arg0: i32, %arg1: i32, %arg2: i32, %arg3: memref<1x4x8x32xf32, #tpu.memory_space<vmem>>, %arg4: memref<1x4x4x64xf32, #tpu.memory_space<vmem>>) attributes {dimension_semantics = [#tpu.dimension_semantics<parallel>, #tpu.dimension_semantics<parallel>, #tpu.dimension_semantics<parallel>], iteration_bounds = array<i64: 2, 1, 1>, scalar_prefetch = 0 : i64, scratch_operands = 0 : i64, tpu.core_type = #tpu.core_type<tc>, window_params = [{transform_indices = @transform_0, window_bounds = array<i64: 1, 4, 8, 32>}, {transform_indices = @transform_1, window_bounds = array<i64: 1, 4, 4, 64>}]} {
    %c0 = arith.constant 0 : index
    %c0_0 = arith.constant 0 : index
    %c0_1 = arith.constant 0 : index
    %c0_2 = arith.constant 0 : index
    %0 = tpu.strided_load %arg3[%c0, %c0_0, %c0_1, %c0_2] {strides = array<i32: 1, 1, 1, 2>} : memref<1x4x8x32xf32, #tpu.memory_space<vmem>>, vector<1x4x8x8xf32>
    %1 = vector.shape_cast %0 : vector<1x4x8x8xf32> to vector<4x8x8xf32>
    %2 = vector.shape_cast %1 : vector<4x8x8xf32> to vector<4x64xf32>
    %c0_3 = arith.constant 0 : index
    %c0_4 = arith.constant 0 : index
    %c0_5 = arith.constant 0 : index
    %c0_6 = arith.constant 0 : index
    %3 = vector.load %arg4[%c0_3, %c0_4, %c0_5, %c0_6] : memref<1x4x4x64xf32, #tpu.memory_space<vmem>>, vector<1x1x4x64xf32>
    %4 = vector.shape_cast %3 : vector<1x1x4x64xf32> to vector<4x64xf32>
    %5 = vector.shape_cast %2 : vector<4x64xf32> to vector<1x1x4x64xf32>
    tpu.vector_store %arg4[%c0_3, %c0_4, %c0_5, %c0_6], %5 {strides = array<i32>} : memref<1x4x4x64xf32, #tpu.memory_space<vmem>>, vector<1x1x4x64xf32>,
    %c0_7 = arith.constant 0 : index
    %c0_8 = arith.constant 0 : index
    %c0_9 = arith.constant 0 : index
    %c1 = arith.constant 1 : index
    %6 = tpu.strided_load %arg3[%c0_7, %c0_8, %c0_9, %c1] {strides = array<i32: 1, 1, 1, 2>} : memref<1x4x8x32xf32, #tpu.memory_space<vmem>>, vector<1x4x8x8xf32>
    %7 = vector.shape_cast %6 : vector<1x4x8x8xf32> to vector<4x8x8xf32>
    %8 = vector.shape_cast %7 : vector<4x8x8xf32> to vector<4x64xf32>
    %c0_10 = arith.constant 0 : index
    %c1_11 = arith.constant 1 : index
    %c0_12 = arith.constant 0 : index
    %c0_13 = arith.constant 0 : index
    %9 = vector.load %arg4[%c0_10, %c1_11, %c0_12, %c0_13] : memref<1x4x4x64xf32, #tpu.memory_space<vmem>>, vector<1x1x4x64xf32>
    %10 = vector.shape_cast %9 : vector<1x1x4x64xf32> to vector<4x64xf32>
    %11 = vector.shape_cast %8 : vector<4x64xf32> to vector<1x1x4x64xf32>
    tpu.vector_store %arg4[%c0_10, %c1_11, %c0_12, %c0_13], %11 {strides = array<i32>} : memref<1x4x4x64xf32, #tpu.memory_space<vmem>>, vector<1x1x4x64xf32>,
    %c0_14 = arith.constant 0 : index
    %c0_15 = arith.constant 0 : index
    %c0_16 = arith.constant 0 : index
    %c16 = arith.constant 16 : index
    %12 = tpu.strided_load %arg3[%c0_14, %c0_15, %c0_16, %c16] {strides = array<i32: 1, 1, 1, 2>} : memref<1x4x8x32xf32, #tpu.memory_space<vmem>>, vector<1x4x8x8xf32>
    %13 = vector.shape_cast %12 : vector<1x4x8x8xf32> to vector<4x8x8xf32>
    %14 = vector.shape_cast %13 : vector<4x8x8xf32> to vector<4x64xf32>
    %c0_17 = arith.constant 0 : index
    %c2 = arith.constant 2 : index
    %c0_18 = arith.constant 0 : index
    %c0_19 = arith.constant 0 : index
    %15 = vector.load %arg4[%c0_17, %c2, %c0_18, %c0_19] : memref<1x4x4x64xf32, #tpu.memory_space<vmem>>, vector<1x1x4x64xf32>
    %16 = vector.shape_cast %15 : vector<1x1x4x64xf32> to vector<4x64xf32>
    %17 = vector.shape_cast %14 : vector<4x64xf32> to vector<1x1x4x64xf32>
    tpu.vector_store %arg4[%c0_17, %c2, %c0_18, %c0_19], %17 {strides = array<i32>} : memref<1x4x4x64xf32, #tpu.memory_space<vmem>>, vector<1x1x4x64xf32>,
    %c0_20 = arith.constant 0 : index
    %c0_21 = arith.constant 0 : index
    %c0_22 = arith.constant 0 : index
    %c17 = arith.constant 17 : index
    %18 = tpu.strided_load %arg3[%c0_20, %c0_21, %c0_22, %c17] {strides = array<i32: 1, 1, 1, 2>} : memref<1x4x8x32xf32, #tpu.memory_space<vmem>>, vector<1x4x8x8xf32>
    %19 = vector.shape_cast %18 : vector<1x4x8x8xf32> to vector<4x8x8xf32>
    %20 = vector.shape_cast %19 : vector<4x8x8xf32> to vector<4x64xf32>
    %c0_23 = arith.constant 0 : index
    %c3 = arith.constant 3 : index
    %c0_24 = arith.constant 0 : index
    %c0_25 = arith.constant 0 : index
    %21 = vector.load %arg4[%c0_23, %c3, %c0_24, %c0_25] : memref<1x4x4x64xf32, #tpu.memory_space<vmem>>, vector<1x1x4x64xf32>
    %22 = vector.shape_cast %21 : vector<1x1x4x64xf32> to vector<4x64xf32>
    %23 = vector.shape_cast %20 : vector<4x64xf32> to vector<1x1x4x64xf32>
    tpu.vector_store %arg4[%c0_23, %c3, %c0_24, %c0_25], %23 {strides = array<i32>} : memref<1x4x4x64xf32, #tpu.memory_space<vmem>>, vector<1x1x4x64xf32>,
    return
  }
  func.func @transform_0(%arg0: i32, %arg1: i32, %arg2: i32) -> (i32, i32, i32, i32) {
    %c0_i32 = arith.constant 0 : i32
    %c0_i32_0 = arith.constant 0 : i32
    return %arg0, %arg1, %arg2, %c0_i32 : i32, i32, i32, i32
  }
  func.func @transform_1(%arg0: i32, %arg1: i32, %arg2: i32) -> (i32, i32, i32, i32) {
    %c0_i32 = arith.constant 0 : i32
    %c0_i32_0 = arith.constant 0 : i32
    return %arg0, %c0_i32, %arg1, %arg2 : i32, i32, i32, i32
  }
}

module attributes {stable_mosaic.version = 11 : i64} {
  func.func @_downblock_kernel_reshape(%arg0: i32, %arg1: i32, %arg2: i32, %arg3: memref<1x4x8x32xf32, #tpu.memory_space<vmem>>, %arg4: memref<1x4x4x64xf32, #tpu.memory_space<vmem>>) attributes {dimension_semantics = [#tpu.dimension_semantics<parallel>, #tpu.dimension_semantics<parallel>, #tpu.dimension_semantics<parallel>], iteration_bounds = array<i64: 2, 1, 1>, scalar_prefetch = 0 : i64, scratch_operands = 0 : i64, tpu.core_type = #tpu.core_type<tc>, window_params = [{transform_indices = @transform_0, window_bounds = array<i64: 1, 4, 8, 32>}, {transform_indices = @transform_1, window_bounds = array<i64: 1, 4, 4, 64>}]} {
    %c0 = arith.constant 0 : index
    %c0_0 = arith.constant 0 : index
    %c0_1 = arith.constant 0 : index
    %c0_2 = arith.constant 0 : index
    %0 = vector.load %arg3[%c0, %c0_0, %c0_1, %c0_2] : memref<1x4x8x32xf32, #tpu.memory_space<vmem>>, vector<1x4x8x16xf32>
    %1 = vector.shape_cast %0 : vector<1x4x8x16xf32> to vector<4x8x16xf32>
    %2 = vector.shape_cast %1 : vector<4x8x16xf32> to vector<4x8x8x2xf32>
    %3 = vector.extract_strided_slice %2 {offsets = [0, 0, 0, 0], sizes = [4, 8, 8, 1], strides = [1, 1, 1, 1]} : vector<4x8x8x2xf32> to vector<4x8x8x1xf32>
    %4 = vector.shape_cast %3 : vector<4x8x8x1xf32> to vector<4x8x8xf32>
    %5 = vector.shape_cast %4 : vector<4x8x8xf32> to vector<4x64xf32>
    %c0_3 = arith.constant 0 : index
    %c0_4 = arith.constant 0 : index
    %c0_5 = arith.constant 0 : index
    %c0_6 = arith.constant 0 : index
    %6 = vector.load %arg4[%c0_3, %c0_4, %c0_5, %c0_6] : memref<1x4x4x64xf32, #tpu.memory_space<vmem>>, vector<1x1x4x64xf32>
    %7 = vector.shape_cast %6 : vector<1x1x4x64xf32> to vector<4x64xf32>
    %8 = vector.shape_cast %5 : vector<4x64xf32> to vector<1x1x4x64xf32>
    tpu.vector_store %arg4[%c0_3, %c0_4, %c0_5, %c0_6], %8 {strides = array<i32>} : memref<1x4x4x64xf32, #tpu.memory_space<vmem>>, vector<1x1x4x64xf32>,
    %9 = vector.extract_strided_slice %2 {offsets = [0, 0, 0, 1], sizes = [4, 8, 8, 1], strides = [1, 1, 1, 1]} : vector<4x8x8x2xf32> to vector<4x8x8x1xf32>
    %10 = vector.shape_cast %9 : vector<4x8x8x1xf32> to vector<4x8x8xf32>
    %11 = vector.shape_cast %10 : vector<4x8x8xf32> to vector<4x64xf32>
    %c0_7 = arith.constant 0 : index
    %c1 = arith.constant 1 : index
    %c0_8 = arith.constant 0 : index
    %c0_9 = arith.constant 0 : index
    %12 = vector.load %arg4[%c0_7, %c1, %c0_8, %c0_9] : memref<1x4x4x64xf32, #tpu.memory_space<vmem>>, vector<1x1x4x64xf32>
    %13 = vector.shape_cast %12 : vector<1x1x4x64xf32> to vector<4x64xf32>
    %14 = vector.shape_cast %11 : vector<4x64xf32> to vector<1x1x4x64xf32>
    tpu.vector_store %arg4[%c0_7, %c1, %c0_8, %c0_9], %14 {strides = array<i32>} : memref<1x4x4x64xf32, #tpu.memory_space<vmem>>, vector<1x1x4x64xf32>,
    %c0_10 = arith.constant 0 : index
    %c0_11 = arith.constant 0 : index
    %c0_12 = arith.constant 0 : index
    %c16 = arith.constant 16 : index
    %15 = vector.load %arg3[%c0_10, %c0_11, %c0_12, %c16] : memref<1x4x8x32xf32, #tpu.memory_space<vmem>>, vector<1x4x8x16xf32>
    %16 = vector.shape_cast %15 : vector<1x4x8x16xf32> to vector<4x8x16xf32>
    %17 = vector.shape_cast %16 : vector<4x8x16xf32> to vector<4x8x8x2xf32>
    %18 = vector.extract_strided_slice %17 {offsets = [0, 0, 0, 0], sizes = [4, 8, 8, 1], strides = [1, 1, 1, 1]} : vector<4x8x8x2xf32> to vector<4x8x8x1xf32>
    %19 = vector.shape_cast %18 : vector<4x8x8x1xf32> to vector<4x8x8xf32>
    %20 = vector.shape_cast %19 : vector<4x8x8xf32> to vector<4x64xf32>
    %c0_13 = arith.constant 0 : index
    %c2 = arith.constant 2 : index
    %c0_14 = arith.constant 0 : index
    %c0_15 = arith.constant 0 : index
    %21 = vector.load %arg4[%c0_13, %c2, %c0_14, %c0_15] : memref<1x4x4x64xf32, #tpu.memory_space<vmem>>, vector<1x1x4x64xf32>
    %22 = vector.shape_cast %21 : vector<1x1x4x64xf32> to vector<4x64xf32>
    %23 = vector.shape_cast %20 : vector<4x64xf32> to vector<1x1x4x64xf32>
    tpu.vector_store %arg4[%c0_13, %c2, %c0_14, %c0_15], %23 {strides = array<i32>} : memref<1x4x4x64xf32, #tpu.memory_space<vmem>>, vector<1x1x4x64xf32>,
    %24 = vector.extract_strided_slice %17 {offsets = [0, 0, 0, 1], sizes = [4, 8, 8, 1], strides = [1, 1, 1, 1]} : vector<4x8x8x2xf32> to vector<4x8x8x1xf32>
    %25 = vector.shape_cast %24 : vector<4x8x8x1xf32> to vector<4x8x8xf32>
    %26 = vector.shape_cast %25 : vector<4x8x8xf32> to vector<4x64xf32>
    %c0_16 = arith.constant 0 : index
    %c3 = arith.constant 3 : index
    %c0_17 = arith.constant 0 : index
    %c0_18 = arith.constant 0 : index
    %27 = vector.load %arg4[%c0_16, %c3, %c0_17, %c0_18] : memref<1x4x4x64xf32, #tpu.memory_space<vmem>>, vector<1x1x4x64xf32>
    %28 = vector.shape_cast %27 : vector<1x1x4x64xf32> to vector<4x64xf32>
    %29 = vector.shape_cast %26 : vector<4x64xf32> to vector<1x1x4x64xf32>
    tpu.vector_store %arg4[%c0_16, %c3, %c0_17, %c0_18], %29 {strides = array<i32>} : memref<1x4x4x64xf32, #tpu.memory_space<vmem>>, vector<1x1x4x64xf32>,
    return
  }
  func.func @transform_0(%arg0: i32, %arg1: i32, %arg2: i32) -> (i32, i32, i32, i32) {
    %c0_i32 = arith.constant 0 : i32
    %c0_i32_0 = arith.constant 0 : i32
    return %arg0, %arg1, %arg2, %c0_i32 : i32, i32, i32, i32
  }
  func.func @transform_1(%arg0: i32, %arg1: i32, %arg2: i32) -> (i32, i32, i32, i32) {
    %c0_i32 = arith.constant 0 : i32
    %c0_i32_0 = arith.constant 0 : i32
    return %arg0, %c0_i32, %arg1, %arg2 : i32, i32, i32, i32
  }
}

</mosaic_0001>

<bundles_post_ra>
// kernel: tpu_custom_call.1
= control target key start
LH: loop header
LB: loop body
LE: loop exit
PB: predicated region body
PF: predicated region fallthrough
CT: control target
= control target key end

     0   :  { %6 = vsyncpa [#allocation3], 0  ;;  %s4176_s0 = inlined_call_operand.hbm [shape: f32[2,4,8,32], index: 0, kind: input, shape index: {}]   ;;  %s4177_s1 = inlined_call_operand.hbm [shape: f32[2,4,4,64], index: 1, kind: output, shape index: {}]  }
   0x1   :  { %8 = vsyncpa [#allocation3 + $0x1], 0 }
   0x2   :  { %9 = vsyncpa [#allocation4], 0 }
   0x3   :  { %11 = vsyncpa [#allocation4 + $0x1], 0  ;;  %s2970_s6 = smov 0   ;;  %s2972_s7 = smov 0  }
   0x4   :  { %s2974_s8 = smov 0   ;;  %s2976_s9 = smov 0  }
   0x5   :  { %s2978_s10 = smov 0   ;;  %s2980_s11 = smov 0  }
   0x6 LB: > { %s2728_s12 = sadd.s32 4294967295, %s2940_s11   ;;  %s2729_s13 = sadd.s32 4294967294, %s2940_s11   ;;  %s2940_s11 = sphi %s2980_s11, %s17_s11   ;;  %s2936_s10 = sphi %s2978_s10, %s4256_s10   ;;  %s2932_s9 = sphi %s2976_s9, %s4255_s9   ;;  %s2928_s8 = sphi %s2974_s8, %s4254_s8   ;;  %s2924_s7 = sphi %s2972_s7, %s4253_s7   ;;  %s2920_s6 = sphi %s2970_s6, %s4252_s6  }
   0x7   : > { %s36_s14 = sadd.s32 1, %s2936_s10  ;;  %s47_s15 = sadd.s32 1, %s2928_s8 }
   0x8   : > { %p38_p0 = scmp.ge.s32.totalorder %s36_s14, 2  ;;  %p54_p1 = scmp.ne.s32.totalorder %s2928_s8, %s2924_s7 }
   0x9   : > { %p55_p2 = scmp.eq.s32.totalorder %s2940_s11, 0  ;;  %p60_p3 = scmp.ne.s32.totalorder %s2924_s7, %s2920_s6 }
   0xa   : > { %s4258_s14 = smov (%p38_p0, %s36_s14), 0  ;;  %p61_p5 = scmp.eq.s32.totalorder %s2728_s12, 0 }
   0xb   : > { %p3011_p4 = por %p55_p2, %p54_p1  ;;  %s40_s17 = ssub.s32 %s2936_s10, %s4258_s14 }
   0xc   : > { %p88_p6 = scmp.eq.s32.totalorder %s2728_s12, 1  ;;  %p45_p7 = scmp.eq.s32.totalorder %s40_s17, 0 }
   0xd   : > { %p3017_p8 = por %p61_p5, %p60_p3  ;;  %p94_p10 = scmp.eq.s32.totalorder %s2729_s13, 1 }
   0xe   : > { %p3021_p9 = por %p88_p6, %p54_p1  ;;  %p2760_p13 = scmp.lt.s32.totalorder %s2940_s11, 2 }
   0xf   : > { %s3026_s20 = scalar_select %p45_p7, %s2928_s8, %s47_s15  }
  0x10   : > { %p3028_p11 = por %p94_p10, %p60_p3  ;;  %s114_s22 = sand.u32 1, %s2928_s8  }
  0x11   : > { %s2732_s23 = sshll.u32 %s114_s22, 5  ;;  %s2746_s24 = sshll.u32 %s2936_s10, 9 }
  0x12   : > { %s127_s27 = scalar_lea.hbm %s4176_s0, %s2746_s24  ;;  %s118_s28 = scalar_lea.vmem [#allocation2], %s2732_s23 }
  0x13   : > { %s128_s29 = sshll.u32 %s118_s28, 4  ;;  %p3041_p0 = pnand %p2760_p13, %p3011_p4  ;;  %s129_s29 = int_to_ptr.vmem [resolvable:$true] %s128_s29 }
  0x14   : > { %p2735_p1 = scmp.ge.s32.totalorder %s2940_s11, 1  ;;  %s115_s2 = scalar_lea.sflag [#allocation3], %s114_s22 }
  0x15   : > { %p2834_p2 = pneg %p3041_p0  ;;  %s2845_s3 = scalar_lea.vmem %s129_s29, 512 }
  0x16   : > { %p2846_p3 = scmp.ne.s32.totalorder %s129_s29, %s2845_s3  ;;  %s2942_s4 = smov [#allocation2]  }
  0x17   : > { %s2850_s5 = sshll.u32 %s2942_s4, 4  ;;  %s2851_s5 = int_to_ptr.vmem [resolvable:$false] %s2850_s5 }
  0x18   : > { %p2848_p5 = pnand %p2846_p3, %p2834_p2  ;;  %s2852_s12 = scalar_lea.vmem %s2851_s5, 1024 }
  0x19   : > { %p2853_p7 = scmp.lt.s32.totalorder %s129_s29, %s2851_s5  ;;  %p2854_p10 = scmp.lt.s32.totalorder %s2852_s12, %s2845_s3 }
  0x1a   : > { %p2849_p6 = pneg %p2848_p5 }
  0x1b   : > { %p2855_p12 = por %p2854_p10, %p2853_p7 }
  0x1d   : > { %p2856_p4 = pnand %p2855_p12, %p2849_p6 }
  0x1f   : > { %2859 = shalt.err (!%p2856_p4)
}
  0x20   : > { %s2943_s13 = smov 128   ;;  %s2944_s15 = smov 8  }
  0x21   : > { %2755 = dma.hbm_to_vmem [thread:$0]  (!%p3041_p0), %s127_s27, 512, %s129_s29, %s115_s2, %s2943_s13, %s2943_s13, %s2944_s15  }
  0x22   : > { %p136_p13 = scmp.lt.s32.totalorder %s2940_s11, 3 }
  0x24   : > { %p137_p2 = pnand %p2735_p1, %p136_p13 }
  0x26   : > { %140 = sbr.rel (%p137_p2) target bundleno = 959 (0x3bf), region = 24 }
  0x2b   : > { %s3054_s16 = sand.u32 1, %s2924_s7  }
  0x2c   : > { %s2736_s17 = sshll.u32 %s3054_s16, 5  ;;  %s143_s22 = scalar_lea.sflag [#allocation3], %s3054_s16 }
  0x2d   : > { %s146_s23 = scalar_lea.vmem [#allocation2], %s2736_s17 }
  0x2e   : > { %2911 = dma.done.wait (%p3017_p8), %s143_s22, 512  }
  0x2f   : > { %2913 = vsyncadd (%p3017_p8), %s143_s22, 4294966784  ;;  %v3062_v0 = vld [vmem:[%s146_s23 + $0x10] sm:$0xff]  ;;  %v3064_v1 = vld [vmem:[%s146_s23] sm:$0xff]  ;;  %s2945_s24 = smov 126   ;;  %s2946_s18 = smov 124   ;;  %v2951_v4 = vmov 0   ;;  %v263_v27 = vlaneseq }
  0x30   : > { %178 = vrot.lane.b32.xlu1 %v3062_v0, %s2945_s24  ;;  %174 = vrot.lane.b32.xlu0 %v3064_v1, %s2945_s24  ;;  %v3070_v2 = vld [vmem:[%s146_s23 + $0x18] sm:$0xff]  ;;  %v3072_v3 = vld [vmem:[%s146_s23 + $0x8] sm:$0xff]  ;;  %s2947_s25 = smov 122   ;;  %s2948_s26 = smov 120   ;;  %v2953_v25 = vmov 1983009808  }
  0x31   : > { %s2949_s27 = smov 118   ;;  %s2950_s28 = smov 116   ;;  %2827 = vset.pattern.permute.xlu1 %v2951_v4  ;;  %2826 = vset.pattern.permute.xlu0 %v2951_v4  ;;  %v261_v26 = vunpack.c.l.s4 %v2953_v25  ;;  %v3159_v30 = vshrl.u32 %v263_v27, 7  ;;  %v2954_v34 = vmov 1934713408   ;;  %vm941_vm0 = vcmask 130112  }
  0x32   : > { %s2952_s29 = smov 114   ;;  %v325_v35 = vunpack.c.l.s4 %v2954_v34  ;;  %s2956_s30 = smov 112   ;;  %vm948_vm1 = vcmask 195712   ;;  %vm955_vm2 = vcmask 261312   ;;  %vm962_vm3 = vcmask 326912  }
  0x33   : > { %v262_v29 = vunpack.c.0.s8 %v261_v26  ;;  %vm969_vm4 = vcmask 392512   ;;  %vm976_vm5 = vcmask 458112   ;;  %vm983_vm6 = vcmask 523712   ;;  %s2737_s2 = sshll.u32 %s3054_s16, 4  ;;  %s2747_s4 = sshll.u32 %s2932_s9, 8 }
  0x34   : > { %180 = vrot.lane.b32.xlu1 %v3070_v2, %s2945_s24  ;;  %176 = vrot.lane.b32.xlu0 %v3072_v3, %s2945_s24  ;;  %v326_v42 = vunpack.c.0.s8 %v325_v35  ;;  %vm1102_vm7 = vcmask 1041409   ;;  %vm1104_vm8 = vcmask 1042434   ;;  %vm1106_vm9 = vcmask 1043459   ;;  %s3573_s3 = scalar_lea.vmem [#allocation5], %s2737_s2  ;;  %s4121_s13 = scalar_lea.hbm %s4177_s1, %s2747_s4 }
  0x35   : > { %v3166_v36 = vsub.s32 %v262_v29, %v3159_v30  ;;  %vm1109_vm10 = vcmask 519168   ;;  %s2637_s5 = sshll.u32 %s3573_s3, 4  ;;  %s2622_s15 = scalar_lea.sflag [#allocation4], %s3054_s16  ;;  %s4123_s5 = int_to_ptr.vmem [resolvable:$true] %s2637_s5 }
  0x36   : > { %v3176_v51 = vsub.s32 %v326_v42, %v3159_v30  ;;  %s2860_s17 = scalar_lea.vmem %s4123_s5, 256  ;;  %s2957_s22 = smov [#allocation5]  }
  0x37   : > { %p2861_p8 = scmp.ne.s32.totalorder %s4123_s5, %s2860_s17  ;;  %s2864_s23 = sshll.u32 %s2957_s22, 4  ;;  %s2865_s23 = int_to_ptr.vmem [resolvable:$false] %s2864_s23 }
  0x38   : > { %188 = vrot.lane.b32.xlu1 %v3072_v3, %s2946_s18  ;;  %186 = vrot.lane.b32.xlu0 %v3064_v1, %s2946_s18  ;;  %p2867_p1 = scmp.lt.s32.totalorder %s4123_s5, %s2865_s23 }
  0x39   : > { %p2862_p12 = pnand %p2861_p8, %p3021_p9 }
  0x3b   : > { %p2863_p0 = pneg %p2862_p12 }
  0x3c   : > { %192 = vrot.lane.b32.xlu1 %v3070_v2, %s2946_s18  ;;  %190 = vrot.lane.b32.xlu0 %v3062_v0, %s2946_s18 }
  0x40   : > { %200 = vrot.lane.b32.xlu1 %v3072_v3, %s2947_s25  ;;  %198 = vrot.lane.b32.xlu0 %v3064_v1, %s2947_s25 }
  0x44   : > { %204 = vrot.lane.b32.xlu1 %v3070_v2, %s2947_s25  ;;  %202 = vrot.lane.b32.xlu0 %v3062_v0, %s2947_s25 }
  0x48   : > { %212 = vrot.lane.b32.xlu1 %v3072_v3, %s2948_s26  ;;  %210 = vrot.lane.b32.xlu0 %v3064_v1, %s2948_s26 }
  0x4c   : > { %216 = vrot.lane.b32.xlu1 %v3070_v2, %s2948_s26  ;;  %214 = vrot.lane.b32.xlu0 %v3062_v0, %s2948_s26 }
  0x50   : > { %224 = vrot.lane.b32.xlu1 %v3072_v3, %s2949_s27  ;;  %222 = vrot.lane.b32.xlu0 %v3064_v1, %s2949_s27 }
  0x54   : > { %228 = vrot.lane.b32.xlu1 %v3070_v2, %s2949_s27  ;;  %226 = vrot.lane.b32.xlu0 %v3062_v0, %s2949_s27 }
  0x58   : > { %236 = vrot.lane.b32.xlu1 %v3072_v3, %s2950_s28  ;;  %234 = vrot.lane.b32.xlu0 %v3064_v1, %s2950_s28 }
  0x5c   : > { %240 = vrot.lane.b32.xlu1 %v3070_v2, %s2950_s28  ;;  %238 = vrot.lane.b32.xlu0 %v3062_v0, %s2950_s28 }
  0x60   : > { %248 = vrot.lane.b32.xlu1 %v3072_v3, %s2952_s29  ;;  %246 = vrot.lane.b32.xlu0 %v3064_v1, %s2952_s29 }
  0x64   : > { %252 = vrot.lane.b32.xlu1 %v3070_v2, %s2952_s29  ;;  %250 = vrot.lane.b32.xlu0 %v3062_v0, %s2952_s29 }
  0xa2   : > { %v3128_v5 = vpop.permute.xlu1 %178  ;;  %v175_v6 = vpop.permute.xlu0 %174 }
  0xa6   : > { %v3130_v7 = vpop.permute.xlu1 %180  ;;  %v3132_v8 = vpop.permute.xlu0 %176 }
  0xaa   : > { %v3134_v9 = vpop.permute.xlu1 %188  ;;  %v187_v10 = vpop.permute.xlu0 %186 }
  0xab   : > { %v258_v37 = vcombine.low %v3064_v1, %v187_v10  ;;  %v259_v52 = vcombine.high %v3064_v1, %v187_v10 }
  0xad   : > { %v266_v44 = vrot.slane %v258_v37, %v3166_v36  ;;  %v273_v62 = vrot.slane %v259_v52, %v3166_v36 }
  0xae   : > { %v3136_v11 = vpop.permute.xlu1 %192  ;;  %v3138_v12 = vpop.permute.xlu0 %190 }
  0xb2   : > { %v3140_v13 = vpop.permute.xlu1 %200  ;;  %v199_v14 = vpop.permute.xlu0 %198 }
  0xb3   : > { %v274_v32 = vcombine.low %v175_v6, %v199_v14  ;;  %v275_v46 = vcombine.high %v175_v6, %v199_v14  ;;  %v410_v25 = vcombine.low %v3132_v8, %v3140_v13  ;;  %v411_v52 = vcombine.high %v3132_v8, %v3140_v13 }
  0xb5   : > { %v282_v38 = vrot.slane %v274_v32, %v3166_v36  ;;  %v289_v57 = vrot.slane %v275_v46, %v3166_v36 }
  0xb6   : > { %v3142_v15 = vpop.permute.xlu1 %204  ;;  %v3144_v16 = vpop.permute.xlu0 %202 }
  0xb7   : > { %v322_v48 = vcombine.low %v266_v44, %v282_v38  ;;  %v323_v58 = vcombine.high %v266_v44, %v282_v38  ;;  %v338_v26 = vcombine.low %v273_v62, %v289_v57  ;;  %v339_v42 = vcombine.high %v273_v62, %v289_v57 }
  0xb9   : > { %v330_v60 = vrot.slane %v322_v48, %v3176_v51  ;;  %v337_v29 = vrot.slane %v323_v58, %v3176_v51  ;;  %v346_v44 = vrot.slane %v338_v26, %v3176_v51 }
  0xba   : > { %v3146_v17 = vpop.permute.xlu1 %212  ;;  %v211_v18 = vpop.permute.xlu0 %210 }
  0xbe   : > { %v3148_v19 = vpop.permute.xlu1 %216  ;;  %v3150_v20 = vpop.permute.xlu0 %214 }
  0xc2   : > { %v3152_v21 = vpop.permute.xlu1 %224  ;;  %v223_v22 = vpop.permute.xlu0 %222 }
  0xc6   : > { %v3154_v23 = vpop.permute.xlu1 %228  ;;  %v3156_v24 = vpop.permute.xlu0 %226 }
  0xca   : > { %v235_v28 = vpop.permute.xlu0 %234  ;;  %v3161_v31 = vpop.permute.xlu1 %236 }
  0xcb   : > { %v290_v39 = vcombine.low %v211_v18, %v235_v28  ;;  %v291_v49 = vcombine.high %v211_v18, %v235_v28  ;;  %v426_v28 = vcombine.low %v3146_v17, %v3161_v31 }
  0xcd   : > { %v298_v50 = vrot.slane %v290_v39, %v3166_v36  ;;  %v305_v59 = vrot.slane %v291_v49, %v3166_v36  ;;  %v395_v49 = vcombine.high %v3072_v3, %v3134_v9 }
  0xce   : > { %v3163_v33 = vpop.permute.xlu0 %238  ;;  %v3170_v40 = vpop.permute.xlu1 %240 }
  0xcf   : > { %v409_v58 = vrot.slane %v395_v49, %v3166_v36  ;;  %v562_v26 = vcombine.low %v3150_v20, %v3163_v33 }
  0xd2   : > { %v247_v41 = vpop.permute.xlu0 %246  ;;  %v249_v53 = vpop.permute.xlu1 %248 }
  0xd3   : > { %v306_v43 = vcombine.low %v223_v22, %v247_v41  ;;  %v307_v45 = vcombine.high %v223_v22, %v247_v41  ;;  %v442_v63 = vcombine.low %v3152_v21, %v249_v53  ;;  %v394_v22 = vcombine.low %v3072_v3, %v3134_v9 }
  0xd4   : > { %v418_v41 = vrot.slane %v410_v25, %v3166_v36  ;;  %v546_v25 = vcombine.low %v3128_v5, %v3144_v16 }
  0xd5   : > { %v314_v47 = vrot.slane %v306_v43, %v3166_v36  ;;  %v321_v54 = vrot.slane %v307_v45, %v3166_v36  ;;  %v450_v32 = vrot.slane %v442_v63, %v3166_v36  ;;  %v402_v38 = vrot.slane %v394_v22, %v3166_v36 }
  0xd6   : > { %v434_v43 = vrot.slane %v426_v28, %v3166_v36  ;;  %v443_v45 = vcombine.high %v3152_v21, %v249_v53  ;;  %v353_v21 = vrot.slane %v339_v42, %v3176_v51  ;;  %v251_v8 = vpop.permute.xlu0 %250 }
  0xd7   : > { %v354_v55 = vcombine.low %v298_v50, %v314_v47  ;;  %v355_v56 = vcombine.high %v298_v50, %v314_v47  ;;  %v370_v6 = vcombine.low %v305_v59, %v321_v54  ;;  %v371_v34 = vcombine.high %v305_v59, %v321_v54 }
  0xd8   : > { %v490_v46 = vcombine.low %v434_v43, %v450_v32  ;;  %v458_v54 = vcombine.low %v402_v38, %v418_v41  ;;  %v457_v53 = vrot.slane %v443_v45, %v3166_v36  ;;  %v578_v62 = vcombine.low %v3156_v24, %v251_v8 }
  0xd9   : > { %v362_v61 = vrot.slane %v354_v55, %v3176_v51  ;;  %v369_v18 = vrot.slane %v355_v56, %v3176_v51  ;;  %v378_v37 = vrot.slane %v370_v6, %v3176_v51  ;;  %v385_v48 = vrot.slane %v371_v34, %v3176_v51 }
  0xda   : > { %v427_v55 = vcombine.high %v3146_v17, %v3161_v31  ;;  %v491_v56 = vcombine.high %v434_v43, %v450_v32  ;;  %v498_v9 = vrot.slane %v490_v46, %v3176_v51  ;;  %v425_v17 = vrot.slane %v411_v52, %v3166_v36 }
  0xdb   : > { %v3186_v10 = vcombine.high %v330_v60, %v362_v61  ;;  %v3188_v14 = vcombine.low %v330_v60, %v362_v61  ;;  %v3201_v35 = vcombine.low %v337_v29, %v369_v18  ;;  %v3205_v39 = vcombine.high %v337_v29, %v369_v18 }
  0xdc   : > { %v3213_v47 = vcombine.low %v346_v44, %v378_v37  ;;  %v3218_v50 = vcombine.high %v346_v44, %v378_v37  ;;  %v3228_v57 = vcombine.low %v353_v21, %v385_v48  ;;  %v3232_v13 = vcombine.high %v353_v21, %v385_v48 }
  0xdd   : > { %838 = vperm.xlu1 %2827, %v3186_v10   ;;  %835 = vperm.xlu0 %2826, %v3188_v14   ;;  %v459_v31 = vcombine.high %v402_v38, %v418_v41  ;;  %v441_v59 = vrot.slane %v427_v55, %v3166_v36  ;;  %v466_v60 = vrot.slane %v458_v54, %v3176_v51 }
  0xde   : > { %v505_v6 = vrot.slane %v491_v56, %v3176_v51  ;;  %v474_v22 = vcombine.low %v409_v58, %v425_v17  ;;  %v530_v29 = vcombine.low %v3062_v0, %v3138_v12  ;;  %v586_v34 = vrot.slane %v578_v62, %v3166_v36 }
  0xdf   : > { %v506_v61 = vcombine.low %v441_v59, %v457_v53  ;;  %v3240_v63 = vcombine.low %v466_v60, %v498_v9  ;;  %v3243_v18 = vcombine.high %v466_v60, %v498_v9  ;;  %v473_v28 = vrot.slane %v459_v31, %v3176_v51 }
  0xe0   : > { %v507_v32 = vcombine.high %v441_v59, %v457_v53  ;;  %v475_v42 = vcombine.high %v409_v58, %v425_v17  ;;  %v554_v43 = vrot.slane %v546_v25, %v3166_v36  ;;  %v570_v44 = vrot.slane %v562_v26, %v3166_v36 }
  0xe1   : > { %841 = vperm.xlu1 %2827, %v3201_v35   ;;  %844 = vperm.xlu0 %2826, %v3205_v39   ;;  %v3255_v37 = vcombine.low %v473_v28, %v505_v6  ;;  %v514_v38 = vrot.slane %v506_v61, %v3176_v51  ;;  %v3258_v41 = vcombine.high %v473_v28, %v505_v6 }
  0xe2   : > { %v482_v45 = vrot.slane %v474_v22, %v3176_v51  ;;  %v538_v46 = vrot.slane %v530_v29, %v3166_v36  ;;  %v579_v48 = vcombine.high %v3156_v24, %v251_v8  ;;  %v626_v49 = vcombine.low %v570_v44, %v586_v34 }
  0xe3   : > { %v521_v54 = vrot.slane %v507_v32, %v3176_v51  ;;  %v547_v21 = vcombine.high %v3128_v5, %v3144_v16  ;;  %v563_v56 = vcombine.high %v3150_v20, %v3163_v33  ;;  %v489_v9 = vrot.slane %v475_v42, %v3176_v51  ;;  %v253_v16 = vpop.permute.xlu1 %252 }
  0xe4   : > { %v3267_v52 = vcombine.low %v482_v45, %v514_v38  ;;  %v3270_v55 = vcombine.high %v482_v45, %v514_v38  ;;  %v594_v53 = vcombine.low %v538_v46, %v554_v43  ;;  %v531_v24 = vcombine.high %v3062_v0, %v3138_v12 }
  0xe5   : > { %847 = vperm.xlu1 %2827, %v3213_v47   ;;  %850 = vperm.xlu0 %2826, %v3218_v50   ;;  %v593_v58 = vrot.slane %v579_v48, %v3166_v36  ;;  %v627_v8 = vcombine.high %v570_v44, %v586_v34  ;;  %v3282_v17 = vcombine.low %v489_v9, %v521_v54 }
  0xe6   : > { %v634_v5 = vrot.slane %v626_v49, %v3176_v51  ;;  %v3285_v31 = vcombine.high %v489_v9, %v521_v54  ;;  %v561_v20 = vrot.slane %v547_v21, %v3166_v36  ;;  %v595_v33 = vcombine.high %v538_v46, %v554_v43 }
  0xe7   : > { %v577_v59 = vrot.slane %v563_v56, %v3166_v36  ;;  %v602_v12 = vrot.slane %v594_v53, %v3176_v51  ;;  %v545_v60 = vrot.slane %v531_v24, %v3166_v36  ;;  %v714_v61 = vcombine.low %v3154_v23, %v253_v16 }
  0xe8   : > { %v641_v22 = vrot.slane %v627_v8, %v3176_v51  ;;  %v666_v25 = vcombine.low %v3070_v2, %v3136_v11  ;;  %v682_v28 = vcombine.low %v3130_v7, %v3142_v15  ;;  %v698_v32 = vcombine.low %v3148_v19, %v3170_v40 }
  0xe9   : > { %853 = vperm.xlu1 %2827, %v3228_v57   ;;  %856 = vperm.xlu0 %2826, %v3232_v13   ;;  %v642_v62 = vcombine.low %v577_v59, %v593_v58  ;;  %v3294_v6 = vcombine.low %v602_v12, %v634_v5  ;;  %v3299_v26 = vcombine.high %v602_v12, %v634_v5 }
  0xea   : > { %v610_v29 = vcombine.low %v545_v60, %v561_v20  ;;  %v609_v34 = vrot.slane %v595_v33, %v3176_v51  ;;  %v722_v38 = vrot.slane %v714_v61, %v3166_v36  ;;  %v643_v42 = vcombine.high %v577_v59, %v593_v58 }
  0xeb   : > { %v650_v44 = vrot.slane %v642_v62, %v3176_v51  ;;  %v674_v45 = vrot.slane %v666_v25, %v3166_v36  ;;  %v690_v48 = vrot.slane %v682_v28, %v3166_v36  ;;  %v611_v49 = vcombine.high %v545_v60, %v561_v20 }
  0xec   : > { %v3309_v43 = vcombine.low %v609_v34, %v641_v22  ;;  %v3313_v46 = vcombine.high %v609_v34, %v641_v22  ;;  %v706_v54 = vrot.slane %v698_v32, %v3166_v36  ;;  %v618_v21 = vrot.slane %v610_v29, %v3176_v51 }
  0xed   : > { %859 = vperm.xlu1 %2827, %v3240_v63   ;;  %862 = vperm.xlu0 %2826, %v3243_v18   ;;  %v715_v53 = vcombine.high %v3154_v23, %v253_v16  ;;  %v657_v24 = vrot.slane %v643_v42, %v3176_v51  ;;  %v667_v58 = vcombine.high %v3070_v2, %v3136_v11 }
  0xee   : > { %v762_v56 = vcombine.low %v706_v54, %v722_v38  ;;  %v3321_v9 = vcombine.low %v618_v21, %v650_v44  ;;  %v3326_v8 = vcombine.high %v618_v21, %v650_v44  ;;  %v683_v5 = vcombine.high %v3130_v7, %v3142_v15 }
  0xef   : > { %v730_v20 = vcombine.low %v674_v45, %v690_v48  ;;  %v699_v33 = vcombine.high %v3148_v19, %v3170_v40  ;;  %v625_v23 = vrot.slane %v611_v49, %v3176_v51  ;;  %v729_v16 = vrot.slane %v715_v53, %v3166_v36 }
  0xf0   : > { %v763_v59 = vcombine.high %v706_v54, %v722_v38  ;;  %v770_v11 = vrot.slane %v762_v56, %v3176_v51  ;;  %v681_v60 = vrot.slane %v667_v58, %v3166_v36  ;;  %v697_v15 = vrot.slane %v683_v5, %v3166_v36 }
  0xf1   : > { %865 = vperm.xlu1 %2827, %v3255_v37   ;;  %868 = vperm.xlu0 %2826, %v3258_v41   ;;  %v3336_v12 = vcombine.low %v625_v23, %v657_v24  ;;  %v665_v7 = vcombine.high %v625_v23, %v657_v24  ;;  %v731_v61 = vcombine.high %v674_v45, %v690_v48  ;;  %v4178_v58 = vmov 1  }
  0xf2   : > { %v713_v19 = vrot.slane %v699_v33, %v3166_v36  ;;  %v738_v40 = vrot.slane %v730_v20, %v3176_v51  ;;  %v777_v25 = vrot.slane %v763_v59, %v3176_v51  ;;  %v746_v29 = vcombine.low %v681_v60, %v697_v15 }
  0xf3   : > { %v745_v32 = vrot.slane %v731_v61, %v3176_v51  ;;  %v747_v45 = vcombine.high %v681_v60, %v697_v15  ;;  %v931_v33 = vand.u32 127, %v263_v27 }
  0xf4   : > { %v778_v62 = vcombine.low %v713_v19, %v729_v16  ;;  %v3344_v22 = vcombine.low %v738_v40, %v770_v11  ;;  %v795_v28 = vcombine.high %v738_v40, %v770_v11  ;;  %v779_v34 = vcombine.high %v713_v19, %v729_v16 }
  0xf5   : > { %871 = vperm.xlu1 %2827, %v3267_v52   ;;  %874 = vperm.xlu0 %2826, %v3270_v55   ;;  %v3349_v38 = vcombine.low %v745_v32, %v777_v25  ;;  %v797_v44 = vcombine.high %v745_v32, %v777_v25  ;;  %v754_v48 = vrot.slane %v746_v29, %v3176_v51  ;;  %v936_v59 = vadd.s32 4294967288, %v931_v33 }
  0xf6   : > { %v786_v42 = vrot.slane %v778_v62, %v3176_v51  ;;  %v793_v54 = vrot.slane %v779_v34, %v3176_v51  ;;  %v761_v53 = vrot.slane %v747_v45, %v3176_v51  ;;  %v943_v11 = vadd.s32 4294967280, %v931_v33 }
  0xf7   : > { %v950_v15 = vadd.s32 4294967272, %v931_v33  ;;  %v3450_v61 = vsub.s32 %v936_v59, %v3159_v30  ;;  %v3453_v19 = vsub.s32 %v931_v33, %v3159_v30  ;;  %v957_v40 = vadd.s32 4294967264, %v931_v33 }
  0xf8   : > { %v3354_v49 = vcombine.low %v754_v48, %v786_v42  ;;  %v799_v21 = vcombine.high %v754_v48, %v786_v42  ;;  %v3359_v56 = vcombine.low %v761_v53, %v793_v54  ;;  %v801_v24 = vcombine.high %v761_v53, %v793_v54 }
  0xf9   : > { %877 = vperm.xlu1 %2827, %v3282_v17   ;;  %880 = vperm.xlu0 %2826, %v3285_v31   ;;  %4200 = vst [vmem:[#allocation8_spill] sm:$0xff] %v3453_v19  ;;  %v3456_v27 = vsub.s32 %v943_v11, %v3159_v30  ;;  %v964_v29 = vadd.s32 4294967256, %v931_v33  ;;  %v3474_v48 = vsub.s32 %v957_v40, %v3159_v30 }
  0xfb   : > { %4201 = vst [vmem:[#allocation9_spill] sm:$0xff] %v3456_v27  ;;  %4203 = vst [vmem:[#allocation11_spill] sm:$0xff] %v3474_v48 }
  0xfd   : > { %883 = vperm.xlu1 %2827, %v3294_v6   ;;  %886 = vperm.xlu0 %2826, %v3299_v26  }
 0x101   : > { %889 = vperm.xlu1 %2827, %v3309_v43   ;;  %892 = vperm.xlu0 %2826, %v3313_v46  }
 0x105   : > { %895 = vperm.xlu1 %2827, %v3321_v9   ;;  %898 = vperm.xlu0 %2826, %v3326_v8  }
 0x109   : > { %901 = vperm.xlu1 %2827, %v3336_v12   ;;  %904 = vperm.xlu0 %2826, %v665_v7  }
 0x10d   : > { %907 = vperm.xlu1 %2827, %v3344_v22   ;;  %910 = vperm.xlu0 %2826, %v795_v28  }
 0x111   : > { %913 = vperm.xlu1 %2827, %v3349_v38   ;;  %916 = vperm.xlu0 %2826, %v797_v44  }
 0x115   : > { %919 = vperm.xlu1 %2827, %v3354_v49   ;;  %922 = vperm.xlu0 %2826, %v799_v21  }
 0x119   : > { %925 = vperm.xlu1 %2827, %v3359_v56   ;;  %928 = vperm.xlu0 %2826, %v801_v24  }
 0x11d   : > { %2828 = vset.pattern.permute.xlu1 %v4178_v58  ;;  %1377 = vrot.lane.b32.xlu0 %v3064_v1, %s2945_s24 }
 0x11e   : > { %1112 = vperm.xlu1 %2828, %v3188_v14  }
 0x121   : > { %1381 = vrot.lane.b32.xlu0 %v3062_v0, %s2945_s24 }
 0x122   : > { %1118 = vperm.xlu1 %2828, %v3201_v35  }
 0x125   : > { %1385 = vrot.lane.b32.xlu0 %v3064_v1, %s2946_s18 }
 0x126   : > { %1121 = vperm.xlu1 %2828, %v3205_v39  }
 0x129   : > { %1389 = vrot.lane.b32.xlu0 %v3062_v0, %s2946_s18 }
 0x12a   : > { %1127 = vperm.xlu1 %2828, %v3218_v50  }
 0x12d   : > { %1393 = vrot.lane.b32.xlu0 %v3064_v1, %s2947_s25 }
 0x12e   : > { %1133 = vperm.xlu1 %2828, %v3232_v13  }
 0x131   : > { %1397 = vrot.lane.b32.xlu0 %v3062_v0, %s2947_s25 }
 0x132   : > { %1139 = vperm.xlu1 %2828, %v3243_v18  }
 0x135   : > { %1401 = vrot.lane.b32.xlu0 %v3064_v1, %s2948_s26 }
 0x136   : > { %1145 = vperm.xlu1 %2828, %v3258_v41  }
 0x139   : > { %1405 = vrot.lane.b32.xlu0 %v3062_v0, %s2948_s26 }
 0x13a   : > { %1151 = vperm.xlu1 %2828, %v3270_v55  }
 0x13d   : > { %1409 = vrot.lane.b32.xlu0 %v3064_v1, %s2949_s27 }
 0x13e   : > { %1157 = vperm.xlu1 %2828, %v3285_v31  }
 0x141   : > { %1413 = vrot.lane.b32.xlu0 %v3062_v0, %s2949_s27 }
 0x142   : > { %1163 = vperm.xlu1 %2828, %v3299_v26  }
 0x145   : > { %1417 = vrot.lane.b32.xlu0 %v3064_v1, %s2950_s28 }
 0x146   : > { %1169 = vperm.xlu1 %2828, %v3313_v46  }
 0x149   : > { %1421 = vrot.lane.b32.xlu0 %v3062_v0, %s2950_s28 }
 0x14a   : > { %1175 = vperm.xlu1 %2828, %v3326_v8  }
 0x14d   : > { %1425 = vrot.lane.b32.xlu0 %v3064_v1, %s2952_s29 }
 0x14e   : > { %1181 = vperm.xlu1 %2828, %v665_v7  }
 0x151   : > { %1429 = vrot.lane.b32.xlu0 %v3062_v0, %s2952_s29 }
 0x152   : > { %1187 = vperm.xlu1 %2828, %v795_v28   ;;  %v3461_v28 = vsub.s32 %v950_v15, %v3159_v30 }
 0x154   : > { %4202 = vst [vmem:[#allocation10_spill] sm:$0xff] %v3461_v28 }
 0x155   : > { %1433 = vrot.lane.b32.xlu0 %v3064_v1, %s2956_s30 }
 0x156   : > { %1193 = vperm.xlu1 %2828, %v797_v44  }
 0x158   : > { %v3405_v14 = vpop.permute.xlu1 %838  ;;  %v3407_v35 = vpop.permute.xlu0 %835 }
 0x159   : > { %v940_v32 = vrot.slane %v3405_v14, %v3450_v61  ;;  %v935_v34 = vrot.slane %v3407_v35, %v3453_v19  ;;  %v3484_v35 = vsub.s32 %v964_v29, %v3159_v30 }
 0x15a   : > { %1199 = vperm.xlu1 %2828, %v799_v21  }
 0x15b   : > { %4204 = vst [vmem:[#allocation12_spill] sm:$0xff] %v3484_v35 }
 0x15c   : > { %v3409_v39 = vpop.permute.xlu1 %841  ;;  %v3411_v50 = vpop.permute.xlu0 %844 }
 0x15d   : > { %v947_v45 = vrot.slane %v3409_v39, %v3456_v27  ;;  %v978_v39 = vadd.s32 4294967240, %v931_v33  ;;  %v954_v59 = vrot.slane %v3411_v50, %v3461_v28 }
 0x15e   : > { %1205 = vperm.xlu1 %2828, %v801_v24  }
 0x160   : > { %v3413_v13 = vpop.permute.xlu1 %847  ;;  %v3415_v18 = vpop.permute.xlu0 %850 }
 0x162   : > { %1379 = vrot.lane.b32.xlu1 %v3072_v3, %s2945_s24 }
 0x163   : > { %2829 = vset.pattern.permute.xlu1 %v2951_v4 }
 0x164   : > { %v3420_v1 = vpop.permute.xlu1 %853  ;;  %v3422_v41 = vpop.permute.xlu0 %856 }
 0x166   : > { %1383 = vrot.lane.b32.xlu1 %v3070_v2, %s2945_s24  ;;  %s2866_s24 = scalar_lea.vmem %s2865_s23, 512 }
 0x167   : > { %p2868_p3 = scmp.lt.s32.totalorder %s2866_s24, %s2860_s17 }
 0x168   : > { %v860_v55 = vpop.permute.xlu1 %859  ;;  %v863_v31 = vpop.permute.xlu0 %862 }
 0x169   : > { %v988_v42 = vrot.slane %v860_v55, %v3453_v19  ;;  %v992_v44 = vrot.slane %v863_v31, %v3450_v61  ;;  %v971_v55 = vadd.s32 4294967248, %v931_v33  ;;  %v961_v33 = vrot.slane %v3413_v13, %v3474_v48  ;;  %p2869_p5 = por %p2868_p3, %p2867_p1 }
 0x16a   : > { %1387 = vrot.lane.b32.xlu1 %v3072_v3, %s2946_s18 }
 0x16b   : > { %p2870_p6 = pnand %p2869_p5, %p2863_p0 }
 0x16c   : > { %v866_v26 = vpop.permute.xlu1 %865  ;;  %v3428_v46 = vpop.permute.xlu0 %868 }
 0x16d   : > { %v997_v54 = vrot.slane %v866_v26, %v3456_v27  ;;  %v942_v26 = vsel %vm941_vm0, %v940_v32, %v935_v34 }
 0x16e   : > { %1391 = vrot.lane.b32.xlu1 %v3070_v2, %s2946_s18  ;;  %v949_v11 = vsel %vm948_vm1, %v947_v45, %v942_v26  ;;  %v3514_v45 = vsub.s32 %v978_v39, %v3159_v30 }
 0x170   : > { %v3432_v8 = vpop.permute.xlu1 %871  ;;  %v3434_v4 = vpop.permute.xlu0 %874  ;;  %4206 = vst [vmem:[#allocation14_spill] sm:$0xff] %v3514_v45 }
 0x171   : > { %v1007_v15 = vrot.slane %v3432_v8, %v3474_v48  ;;  %v956_v8 = vsel %vm955_vm2, %v954_v59, %v949_v11 }
 0x172   : > { %1395 = vrot.lane.b32.xlu1 %v3072_v3, %s2947_s25 }
 0x174   : > { %v3438_v5 = vpop.permute.xlu1 %877  ;;  %v3440_v20 = vpop.permute.xlu0 %880 }
 0x176   : > { %1399 = vrot.lane.b32.xlu1 %v3070_v2, %s2947_s25 }
 0x178   : > { %v884_v23 = vpop.permute.xlu1 %883  ;;  %v887_v16 = vpop.permute.xlu0 %886 }
 0x179   : > { %v1027_v53 = vrot.slane %v884_v23, %v3453_v19  ;;  %v1031_v24 = vrot.slane %v887_v16, %v3450_v61  ;;  %v993_v23 = vsel %vm941_vm0, %v992_v44, %v988_v42  ;;  %v1002_v16 = vrot.slane %v3428_v46, %v3461_v28 }
 0x17a   : > { %1403 = vrot.lane.b32.xlu1 %v3072_v3, %s2948_s26  ;;  %v3511_v44 = vsub.s32 %v971_v55, %v3159_v30 }
 0x17b   : > { %v1032_v50 = vsel %vm941_vm0, %v1031_v24, %v1027_v53  ;;  %v1012_v24 = vrot.slane %v3434_v4, %v3484_v35 }
 0x17c   : > { %v890_v60 = vpop.permute.xlu1 %889  ;;  %v893_v7 = vpop.permute.xlu0 %892  ;;  %4205 = vst [vmem:[#allocation13_spill] sm:$0xff] %v3511_v44  ;;  %v1017_v55 = vrot.slane %v3438_v5, %v3511_v44  ;;  %v975_v5 = vrot.slane %v3420_v1, %v3511_v44 }
 0x17d   : > { %v1036_v31 = vrot.slane %v890_v60, %v3456_v27  ;;  %v998_v60 = vsel %vm948_vm1, %v997_v54, %v993_v23  ;;  %v1041_v29 = vrot.slane %v893_v7, %v3461_v28  ;;  %v963_v54 = vsel %vm962_vm3, %v961_v33, %v956_v8 }
 0x17e   : > { %1407 = vrot.lane.b32.xlu1 %v3070_v2, %s2948_s26  ;;  %v1003_v7 = vsel %vm955_vm2, %v1002_v16, %v998_v60 }
 0x17f   : > { %v1037_v46 = vsel %vm948_vm1, %v1036_v31, %v1032_v50  ;;  %v1008_v53 = vsel %vm962_vm3, %v1007_v15, %v1003_v7 }
 0x180   : > { %v896_v62 = vpop.permute.xlu1 %895  ;;  %v3458_v25 = vpop.permute.xlu0 %898  ;;  %v1042_v26 = vsel %vm955_vm2, %v1041_v29, %v1037_v46  ;;  %v1013_v33 = vsel %vm969_vm4, %v1012_v24, %v1008_v53 }
 0x181   : > { %v1046_v34 = vrot.slane %v896_v62, %v3474_v48  ;;  %v968_v62 = vrot.slane %v3415_v18, %v3484_v35  ;;  %v1051_v30 = vrot.slane %v3458_v25, %v3484_v35  ;;  %v1018_v15 = vsel %vm976_vm5, %v1017_v55, %v1013_v33 }
 0x182   : > { %1411 = vrot.lane.b32.xlu1 %v3072_v3, %s2949_s27 }
 0x183   : > { %v1047_v23 = vsel %vm962_vm3, %v1046_v34, %v1042_v26  ;;  %v970_v11 = vsel %vm969_vm4, %v968_v62, %v963_v54 }
 0x184   : > { %v3477_v21 = vpop.permute.xlu1 %901  ;;  %v3481_v14 = vpop.permute.xlu0 %904 }
 0x185   : > { %v1056_v18 = vrot.slane %v3477_v21, %v3511_v44  ;;  %v1022_v21 = vrot.slane %v3440_v20, %v3514_v45  ;;  %v1061_v50 = vrot.slane %v3481_v14, %v3514_v45 }
 0x186   : > { %1415 = vrot.lane.b32.xlu1 %v3070_v2, %s2949_s27 }
 0x188   : > { %v908_v40 = vpop.permute.xlu1 %907  ;;  %v911_v32 = vpop.permute.xlu0 %910 }
 0x189   : > { %v1066_v42 = vrot.slane %v908_v40, %v3453_v19  ;;  %v1070_v13 = vrot.slane %v911_v32, %v3450_v61  ;;  %v1052_v40 = vsel %vm969_vm4, %v1051_v30, %v1047_v23  ;;  %v982_v32 = vrot.slane %v3422_v41, %v3514_v45 }
 0x18a   : > { %1419 = vrot.lane.b32.xlu1 %v3072_v3, %s2950_s28  ;;  %v1057_v46 = vsel %vm976_vm5, %v1056_v18, %v1052_v40 }
 0x18b   : > { %v1071_v16 = vsel %vm941_vm0, %v1070_v13, %v1066_v42  ;;  %v977_v42 = vsel %vm976_vm5, %v975_v5, %v970_v11  ;;  %v1023_v13 = vsel %vm983_vm6, %v1022_v21, %v1018_v15  ;;  %v1062_v41 = vsel %vm983_vm6, %v1061_v50, %v1057_v46 }
 0x18c   : > { %v914_v31 = vpop.permute.xlu1 %913  ;;  %v917_v59 = vpop.permute.xlu0 %916  ;;  %v984_v62 = vsel %vm983_vm6, %v982_v32, %v977_v42 }
 0x18d   : > { %v1075_v39 = vrot.slane %v914_v31, %v3456_v27  ;;  %v1080_v4 = vrot.slane %v917_v59, %v3461_v28  ;;  %v1103_v31 = vsel %vm1102_vm7, %v1023_v13, %v984_v62 }
 0x18e   : > { %1423 = vrot.lane.b32.xlu1 %v3070_v2, %s2950_s28  ;;  %v1105_v26 = vsel %vm1104_vm8, %v1062_v41, %v1103_v31 }
 0x18f   : > { %v1076_v25 = vsel %vm948_vm1, %v1075_v39, %v1071_v16 }
 0x190   : > { %v920_v60 = vpop.permute.xlu1 %919  ;;  %v923_v29 = vpop.permute.xlu0 %922  ;;  %v1081_v34 = vsel %vm955_vm2, %v1080_v4, %v1076_v25 }
 0x191   : > { %v1085_v1 = vrot.slane %v920_v60, %v3474_v48  ;;  %v1090_v20 = vrot.slane %v923_v29, %v3484_v35 }
 0x192   : > { %1427 = vrot.lane.b32.xlu1 %v3072_v3, %s2952_s29 }
 0x193   : > { %v1086_v14 = vsel %vm962_vm3, %v1085_v1, %v1081_v34 }
 0x194   : > { %v926_v8 = vpop.permute.xlu1 %925  ;;  %v929_v54 = vpop.permute.xlu0 %928  ;;  %v1091_v53 = vsel %vm969_vm4, %v1090_v20, %v1086_v14 }
 0x195   : > { %v1095_v7 = vrot.slane %v926_v8, %v3511_v44  ;;  %v1100_v24 = vrot.slane %v929_v54, %v3514_v45 }
 0x196   : > { %1431 = vrot.lane.b32.xlu1 %v3070_v2, %s2952_s29 }
 0x197   : > { %v1096_v55 = vsel %vm976_vm5, %v1095_v7, %v1091_v53 }
 0x198   : > { %v1101_v30 = vsel %vm983_vm6, %v1100_v24, %v1096_v55  ;;  %v1378_v59 = vpop.permute.xlu0 %1377 }
 0x199   : > { %v1107_v39 = vsel %vm1106_vm9, %v1101_v30, %v1105_v26  ;;  %v3571_v23 = vpop.permute.xlu1 %1112 }
 0x19a   : > { %4207 = vst [vmem:[#allocation15_spill] sm:$0xff] %v3571_v23  ;;  %1110 = vst.msk [vmem:[%s3573_s3] sm:$0xf] %vm1109_vm10, %v1107_v39  ;;  %1435 = vrot.lane.b32.xlu1 %v1378_v59, %s2956_s30 }
 0x19c   : > { %v1382_v18 = vpop.permute.xlu0 %1381 }
 0x19d   : > { %v3578_v16 = vpop.permute.xlu1 %1118 }
 0x19e   : > { %4208 = vst [vmem:[#allocation16_spill] sm:$0xff] %v3578_v16 }
 0x1a0   : > { %v1386_v4 = vpop.permute.xlu0 %1385 }
 0x1a1   : > { %v3580_v5 = vpop.permute.xlu1 %1121  ;;  %1437 = vrot.lane.b32.xlu0 %v1386_v4, %s2956_s30 }
 0x1a2   : > { %4209 = vst [vmem:[#allocation17_spill] sm:$0xff] %v3580_v5 }
 0x1a4   : > { %v1390_v25 = vpop.permute.xlu0 %1389 }
 0x1a5   : > { %v3583_v11 = vpop.permute.xlu1 %1127 }
 0x1a6   : > { %4210 = vst [vmem:[#allocation18_spill] sm:$0xff] %v3583_v11 }
 0x1a8   : > { %v1394_v33 = vpop.permute.xlu0 %1393 }
 0x1a9   : > { %v3585_v21 = vpop.permute.xlu1 %1133  ;;  %1439 = vrot.lane.b32.xlu1 %v1394_v33, %s2956_s30 }
 0x1aa   : > { %4211 = vst [vmem:[#allocation19_spill] sm:$0xff] %v3585_v21 }
 0x1ac   : > { %v1398_v60 = vpop.permute.xlu0 %1397 }
 0x1ad   : > { %v3588_v15 = vpop.permute.xlu1 %1139 }
 0x1ae   : > { %4212 = vst [vmem:[#allocation20_spill] sm:$0xff] %v3588_v15 }
 0x1b0   : > { %v1402_v40 = vpop.permute.xlu0 %1401 }
 0x1b1   : > { %v3590_v50 = vpop.permute.xlu1 %1145  ;;  %1441 = vrot.lane.b32.xlu0 %v1402_v40, %s2956_s30 }
 0x1b2   : > { %4213 = vst [vmem:[#allocation21_spill] sm:$0xff] %v3590_v50 }
 0x1b4   : > { %v1406_v1 = vpop.permute.xlu0 %1405 }
 0x1b5   : > { %v3593_v29 = vpop.permute.xlu1 %1151 }
 0x1b6   : > { %4214 = vst [vmem:[#allocation22_spill] sm:$0xff] %v3593_v29 }
 0x1b8   : > { %v1410_v32 = vpop.permute.xlu0 %1409 }
 0x1b9   : > { %v3595_v46 = vpop.permute.xlu1 %1157  ;;  %1443 = vrot.lane.b32.xlu1 %v1410_v32, %s2956_s30 }
 0x1ba   : > { %4215 = vst [vmem:[#allocation23_spill] sm:$0xff] %v3595_v46 }
 0x1bc   : > { %v1414_v34 = vpop.permute.xlu0 %1413 }
 0x1bd   : > { %v3598_v20 = vpop.permute.xlu1 %1163 }
 0x1be   : > { %4216 = vst [vmem:[#allocation24_spill] sm:$0xff] %v3598_v20 }
 0x1c0   : > { %v1418_v42 = vpop.permute.xlu0 %1417 }
 0x1c1   : > { %v3600_v14 = vpop.permute.xlu1 %1169  ;;  %1445 = vrot.lane.b32.xlu0 %v1418_v42, %s2956_s30 }
 0x1c2   : > { %4217 = vst [vmem:[#allocation25_spill] sm:$0xff] %v3600_v14 }
 0x1c4   : > { %v1422_v13 = vpop.permute.xlu0 %1421 }
 0x1c5   : > { %v3603_v8 = vpop.permute.xlu1 %1175  ;;  %1449 = vrot.lane.b32.xlu0 %v3072_v3, %s2956_s30 }
 0x1c6   : > { %4218 = vst [vmem:[#allocation26_spill] sm:$0xff] %v3603_v8 }
 0x1c8   : > { %v1426_v41 = vpop.permute.xlu0 %1425 }
 0x1c9   : > { %v3607_v7 = vpop.permute.xlu1 %1181  ;;  %1447 = vrot.lane.b32.xlu1 %v1426_v41, %s2956_s30 }
 0x1ca   : > { %4219 = vst [vmem:[#allocation27_spill] sm:$0xff] %v3607_v7 }
 0x1cd   : > { %v3610_v54 = vpop.permute.xlu1 %1187 }
 0x1ce   : > { %4220 = vst [vmem:[#allocation28_spill] sm:$0xff] %v3610_v54 }
 0x1d1   : > { %v3612_v62 = vpop.permute.xlu1 %1193 }
 0x1d2   : > { %4221 = vst [vmem:[#allocation29_spill] sm:$0xff] %v3612_v62 }
 0x1d5   : > { %v3614_v53 = vpop.permute.xlu1 %1199 }
 0x1d6   : > { %4222 = vst [vmem:[#allocation30_spill] sm:$0xff] %v3614_v53 }
 0x1d9   : > { %v3616_v24 = vpop.permute.xlu1 %1205 }
 0x1da   : > { %4223 = vst [vmem:[#allocation31_spill] sm:$0xff] %v3616_v24 }
 0x1dd   : > { %v1380_v31 = vpop.permute.xlu1 %1379 }
 0x1de   : > { %1451 = vrot.lane.b32.xlu1 %v1380_v31, %s2956_s30  ;;  %v1430_v31 = vpop.permute.xlu0 %1429 }
 0x1e1   : > { %v1384_v55 = vpop.permute.xlu1 %1383 }
 0x1e5   : > { %v1388_v26 = vpop.permute.xlu1 %1387 }
 0x1e6   : > { %1453 = vrot.lane.b32.xlu0 %v1388_v26, %s2956_s30 }
 0x1e9   : > { %v1392_v3 = vpop.permute.xlu1 %1391 }
 0x1ed   : > { %v1396_v30 = vpop.permute.xlu1 %1395 }
 0x1ee   : > { %1455 = vrot.lane.b32.xlu1 %v1396_v30, %s2956_s30 }
 0x1f1   : > { %v1400_v39 = vpop.permute.xlu1 %1399 }
 0x1f5   : > { %v1404_v59 = vpop.permute.xlu1 %1403 }
 0x1f6   : > { %1457 = vrot.lane.b32.xlu0 %v1404_v59, %s2956_s30 }
 0x1f9   : > { %v1408_v4 = vpop.permute.xlu1 %1407 }
 0x1fd   : > { %v1412_v33 = vpop.permute.xlu1 %1411 }
 0x1fe   : > { %1459 = vrot.lane.b32.xlu1 %v1412_v33, %s2956_s30 }
 0x201   : > { %v1416_v40 = vpop.permute.xlu1 %1415 }
 0x205   : > { %v1420_v32 = vpop.permute.xlu1 %1419 }
 0x206   : > { %1461 = vrot.lane.b32.xlu0 %v1420_v32, %s2956_s30 }
 0x209   : > { %v1424_v42 = vpop.permute.xlu1 %1423 }
 0x20a   : > { %1465 = vrot.lane.b32.xlu0 %v3062_v0, %s2956_s30 }
 0x20d   : > { %v1428_v41 = vpop.permute.xlu1 %1427 }
 0x20e   : > { %1469 = vrot.lane.b32.xlu0 %v1390_v25, %s2956_s30  ;;  %1463 = vrot.lane.b32.xlu1 %v1428_v41, %s2956_s30 }
 0x211   : > { %v1432_v0 = vpop.permute.xlu1 %1431 }
 0x212   : > { %1473 = vrot.lane.b32.xlu0 %v1406_v1, %s2956_s30  ;;  %1467 = vrot.lane.b32.xlu1 %v1382_v18, %s2956_s30  ;;  %v1434_v18 = vpop.permute.xlu0 %1433 }
 0x216   : > { %1477 = vrot.lane.b32.xlu0 %v1422_v13, %s2956_s30  ;;  %1471 = vrot.lane.b32.xlu1 %v1398_v60, %s2956_s30  ;;  %v1438_v25 = vpop.permute.xlu0 %1437 }
 0x217   : > { %v1529_v13 = vcombine.low %v1434_v18, %v1438_v25  ;;  %v1530_v33 = vcombine.high %v1434_v18, %v1438_v25 }
 0x219   : > { %v1537_v30 = vrot.slane %v1529_v13, %v3166_v36  ;;  %v1544_v53 = vrot.slane %v1530_v33, %v3166_v36 }
 0x21a   : > { %1481 = vrot.lane.b32.xlu0 %v3070_v2, %s2956_s30  ;;  %1475 = vrot.lane.b32.xlu1 %v1414_v34, %s2956_s30  ;;  %v1436_v2 = vpop.permute.xlu1 %1435 }
 0x21e   : > { %1485 = vrot.lane.b32.xlu0 %v1392_v3, %s2956_s30  ;;  %1479 = vrot.lane.b32.xlu1 %v1430_v31, %s2956_s30  ;;  %v1440_v60 = vpop.permute.xlu1 %1439 }
 0x21f   : > { %v1545_v34 = vcombine.low %v1436_v2, %v1440_v60 }
 0x222   : > { %1489 = vrot.lane.b32.xlu0 %v1408_v4, %s2956_s30  ;;  %1483 = vrot.lane.b32.xlu1 %v1384_v55, %s2956_s30  ;;  %v1553_v55 = vrot.slane %v1545_v34, %v3166_v36  ;;  %v1546_v4 = vcombine.high %v1436_v2, %v1440_v60 }
 0x223   : > { %v1442_v1 = vpop.permute.xlu0 %1441 }
 0x224   : > { %v1560_v24 = vrot.slane %v1546_v4, %v3166_v36 }
 0x226   : > { %1493 = vrot.lane.b32.xlu0 %v1424_v42, %s2956_s30  ;;  %1487 = vrot.lane.b32.xlu1 %v1400_v39, %s2956_s30  ;;  %v1593_v39 = vcombine.low %v1537_v30, %v1553_v55 }
 0x228   : > { %v1601_v34 = vrot.slane %v1593_v39, %v3176_v51 }
 0x22a   : > { %1491 = vrot.lane.b32.xlu1 %v1416_v40, %s2956_s30 }
 0x22b   : > { %v1444_v26 = vpop.permute.xlu1 %1443 }
 0x22e   : > { %1495 = vrot.lane.b32.xlu1 %v1432_v0, %s2956_s30  ;;  %v1594_v0 = vcombine.high %v1537_v30, %v1553_v55 }
 0x233   : > { %v1446_v3 = vpop.permute.xlu0 %1445 }
 0x234   : > { %v1561_v59 = vcombine.low %v1442_v1, %v1446_v3  ;;  %v1562_v41 = vcombine.high %v1442_v1, %v1446_v3  ;;  %v1608_v1 = vrot.slane %v1594_v0, %v3176_v51  ;;  %v1609_v3 = vcombine.low %v1544_v53, %v1560_v24 }
 0x236   : > { %v1569_v31 = vrot.slane %v1561_v59, %v3166_v36  ;;  %v1576_v18 = vrot.slane %v1562_v41, %v3166_v36 }
 0x23b   : > { %v1448_v32 = vpop.permute.xlu1 %1447 }
 0x23c   : > { %v1577_v40 = vcombine.low %v1444_v26, %v1448_v32  ;;  %v1578_v42 = vcombine.high %v1444_v26, %v1448_v32  ;;  %v1617_v32 = vrot.slane %v1609_v3, %v3176_v51 }
 0x23e   : > { %v1585_v58 = vrot.slane %v1577_v40, %v3166_v36  ;;  %v1592_v13 = vrot.slane %v1578_v42, %v3166_v36 }
 0x240   : > { %v1625_v2 = vcombine.low %v1569_v31, %v1585_v58  ;;  %v1626_v25 = vcombine.high %v1569_v31, %v1585_v58  ;;  %v1641_v55 = vcombine.low %v1576_v18, %v1592_v13  ;;  %v1610_v58 = vcombine.high %v1544_v53, %v1560_v24 }
 0x241   : > { %v1642_v39 = vcombine.high %v1576_v18, %v1592_v13 }
 0x242   : > { %v1633_v60 = vrot.slane %v1625_v2, %v3176_v51  ;;  %v1640_v26 = vrot.slane %v1626_v25, %v3176_v51  ;;  %v1649_v40 = vrot.slane %v1641_v55, %v3176_v51  ;;  %v1624_v31 = vrot.slane %v1610_v58, %v3176_v51 }
 0x243   : > { %v1656_v0 = vrot.slane %v1642_v39, %v3176_v51 }
 0x244   : > { %v3655_v30 = vcombine.high %v1601_v34, %v1633_v60  ;;  %v3657_v59 = vcombine.low %v1601_v34, %v1633_v60  ;;  %v3661_v4 = vcombine.low %v1608_v1, %v1640_v26  ;;  %v3663_v33 = vcombine.high %v1608_v1, %v1640_v26  ;;  %v1450_v34 = vpop.permute.xlu0 %1449 }
 0x245   : > { %v3669_v42 = vcombine.low %v1617_v32, %v1649_v40  ;;  %v3671_v41 = vcombine.high %v1617_v32, %v1649_v40  ;;  %v3677_v53 = vcombine.low %v1624_v31, %v1656_v0  ;;  %v3679_v24 = vcombine.high %v1624_v31, %v1656_v0 }
 0x246   : > { %2109 = vperm.xlu1 %2829, %v3655_v30   ;;  %2106 = vperm.xlu0 %2826, %v3657_v59  }
 0x24a   : > { %2112 = vperm.xlu1 %2829, %v3661_v4   ;;  %2115 = vperm.xlu0 %2826, %v3663_v33  }
 0x24e   : > { %2118 = vperm.xlu1 %2829, %v3669_v42   ;;  %2121 = vperm.xlu0 %2826, %v3671_v41  }
 0x250   : > { %v1452_v18 = vpop.permute.xlu1 %1451 }
 0x252   : > { %2124 = vperm.xlu1 %2829, %v3677_v53   ;;  %2127 = vperm.xlu0 %2826, %v3679_v24  }
 0x258   : > { %v1454_v13 = vpop.permute.xlu0 %1453 }
 0x259   : > { %v1665_v55 = vcombine.low %v1450_v34, %v1454_v13  ;;  %v1666_v14 = vcombine.high %v1450_v34, %v1454_v13 }
 0x25b   : > { %v1673_v0 = vrot.slane %v1665_v55, %v3166_v36 }
 0x260   : > { %v1456_v25 = vpop.permute.xlu1 %1455 }
 0x261   : > { %v1681_v1 = vcombine.low %v1452_v18, %v1456_v25  ;;  %v1682_v62 = vcombine.high %v1452_v18, %v1456_v25 }
 0x263   : > { %v1689_v39 = vrot.slane %v1681_v1, %v3166_v36  ;;  %v1696_v55 = vrot.slane %v1682_v62, %v3166_v36 }
 0x265   : > { %v1729_v11 = vcombine.low %v1673_v0, %v1689_v39 }
 0x268   : > { %v1458_v2 = vpop.permute.xlu0 %1457 }
 0x270   : > { %v1460_v26 = vpop.permute.xlu1 %1459 }
 0x278   : > { %v1462_v60 = vpop.permute.xlu0 %1461 }
 0x279   : > { %v1697_v58 = vcombine.low %v1458_v2, %v1462_v60  ;;  %v1698_v8 = vcombine.high %v1458_v2, %v1462_v60  ;;  %v1680_v2 = vrot.slane %v1666_v14, %v3166_v36 }
 0x27b   : > { %v1705_v7 = vrot.slane %v1697_v58, %v3166_v36  ;;  %v1737_v58 = vrot.slane %v1729_v11, %v3176_v51 }
 0x27c   : > { %v3683_v3 = vpop.permute.xlu0 %1465 }
 0x280   : > { %v1464_v32 = vpop.permute.xlu1 %1463  ;;  %v3686_v40 = vpop.permute.xlu0 %1469 }
 0x281   : > { %v1713_v31 = vcombine.low %v1460_v26, %v1464_v32  ;;  %v1714_v21 = vcombine.high %v1460_v26, %v1464_v32  ;;  %v1730_v26 = vcombine.high %v1673_v0, %v1689_v39  ;;  %v1712_v32 = vrot.slane %v1698_v8, %v3166_v36 }
 0x282   : > { %v1801_v14 = vcombine.low %v3683_v3, %v3686_v40  ;;  %v1746_v0 = vcombine.high %v1680_v2, %v1696_v55 }
 0x283   : > { %v1721_v46 = vrot.slane %v1713_v31, %v3166_v36  ;;  %v1728_v1 = vrot.slane %v1714_v21, %v3166_v36 }
 0x284   : > { %v1468_v29 = vpop.permute.xlu1 %1467  ;;  %v3691_v54 = vpop.permute.xlu0 %1473  ;;  %v1760_v23 = vrot.slane %v1746_v0, %v3176_v51 }
 0x285   : > { %v1761_v50 = vcombine.low %v1705_v7, %v1721_v46  ;;  %v1762_v5 = vcombine.high %v1705_v7, %v1721_v46  ;;  %v1777_v34 = vcombine.low %v1712_v32, %v1728_v1  ;;  %v1745_v46 = vcombine.low %v1680_v2, %v1696_v55 }
 0x287   : > { %v1769_v20 = vrot.slane %v1761_v50, %v3176_v51  ;;  %v1776_v60 = vrot.slane %v1762_v5, %v3176_v51  ;;  %v1744_v50 = vrot.slane %v1730_v26, %v3176_v51  ;;  %v1778_v5 = vcombine.high %v1712_v32, %v1728_v1 }
 0x288   : > { %v1472_v18 = vpop.permute.xlu1 %1471  ;;  %v1478_v25 = vpop.permute.xlu0 %1477  ;;  %v1785_v62 = vrot.slane %v1777_v34, %v3176_v51  ;;  %v1753_v26 = vrot.slane %v1745_v46, %v3176_v51  ;;  %v1809_v1 = vrot.slane %v1801_v14, %v3166_v36 }
 0x289   : > { %v3700_v13 = vcombine.high %v1737_v58, %v1769_v20  ;;  %v3702_v21 = vcombine.low %v1737_v58, %v1769_v20  ;;  %v1817_v7 = vcombine.low %v1468_v29, %v1472_v18  ;;  %v3712_v39 = vcombine.high %v1744_v50, %v1776_v60 }
 0x28a   : > { %v3714_v20 = vcombine.low %v1744_v50, %v1776_v60  ;;  %v1833_v31 = vcombine.low %v3691_v54, %v1478_v25  ;;  %v1792_v60 = vrot.slane %v1778_v5, %v3176_v51  ;;  %v3725_v50 = vcombine.high %v1753_v26, %v1785_v62 }
 0x28b   : > { %2133 = vperm.xlu0 %2826, %v3700_v13   ;;  %2130 = vperm.xlu1 %2829, %v3702_v21   ;;  %v1825_v58 = vrot.slane %v1817_v7, %v3166_v36  ;;  %v3727_v55 = vcombine.low %v1753_v26, %v1785_v62  ;;  %v1818_v2 = vcombine.high %v1468_v29, %v1472_v18 }
 0x28c   : > { %v1476_v11 = vpop.permute.xlu1 %1475  ;;  %v3707_v8 = vpop.permute.xlu0 %1481  ;;  %v1841_v46 = vrot.slane %v1833_v31, %v3166_v36  ;;  %v1834_v44 = vcombine.high %v3691_v54, %v1478_v25  ;;  %v3740_v62 = vcombine.high %v1760_v23, %v1792_v60  ;;  %v3742_v31 = vcombine.low %v1760_v23, %v1792_v60 }
 0x28d   : > { %v1865_v45 = vcombine.low %v1809_v1, %v1825_v58  ;;  %v1832_v54 = vrot.slane %v1818_v2, %v3166_v36  ;;  %v1866_v0 = vcombine.high %v1809_v1, %v1825_v58 }
 0x28e   : > { %4224 = vst [vmem:[#allocation32_spill] sm:$0xff] %v3740_v62 }
 0x28f   : > { %2139 = vperm.xlu0 %2826, %v3712_v39   ;;  %2136 = vperm.xlu1 %2829, %v3714_v20   ;;  %v1873_v26 = vrot.slane %v1865_v45, %v3176_v51  ;;  %v1880_v45 = vrot.slane %v1866_v0, %v3176_v51 }
 0x290   : > { %v1480_v16 = vpop.permute.xlu1 %1479  ;;  %v3721_v15 = vpop.permute.xlu0 %1485 }
 0x291   : > { %v1849_v32 = vcombine.low %v1476_v11, %v1480_v16  ;;  %v1850_v34 = vcombine.high %v1476_v11, %v1480_v16  ;;  %v1802_v16 = vcombine.high %v3683_v3, %v3686_v40 }
 0x293   : > { %v1857_v7 = vrot.slane %v1849_v32, %v3166_v36  ;;  %2145 = vperm.xlu0 %2826, %v3725_v50   ;;  %2142 = vperm.xlu1 %2829, %v3727_v55   ;;  %v1864_v29 = vrot.slane %v1850_v34, %v3166_v36  ;;  %v1848_v32 = vrot.slane %v1834_v44, %v3166_v36 }
 0x294   : > { %v3735_v14 = vpop.permute.xlu1 %1483  ;;  %v1490_v5 = vpop.permute.xlu0 %1489  ;;  %v1816_v40 = vrot.slane %v1802_v16, %v3166_v36 }
 0x295   : > { %v1897_v11 = vcombine.low %v1841_v46, %v1857_v7  ;;  %v1898_v18 = vcombine.high %v1841_v46, %v1857_v7  ;;  %v1913_v23 = vcombine.low %v1848_v32, %v1864_v29  ;;  %v1937_v7 = vcombine.low %v3707_v8, %v3721_v15 }
 0x296   : > { %v1881_v1 = vcombine.low %v1816_v40, %v1832_v54  ;;  %v1914_v16 = vcombine.high %v1848_v32, %v1864_v29  ;;  %v1882_v35 = vcombine.high %v1816_v40, %v1832_v54 }
 0x297   : > { %v1905_v25 = vrot.slane %v1897_v11, %v3176_v51  ;;  %2151 = vperm.xlu0 %2826, %v3740_v62   ;;  %2148 = vperm.xlu1 %2829, %v3742_v31   ;;  %v1912_v34 = vrot.slane %v1898_v18, %v3176_v51  ;;  %v1921_v11 = vrot.slane %v1913_v23, %v3176_v51 }
 0x298   : > { %v1488_v3 = vpop.permute.xlu1 %1487  ;;  %v1494_v44 = vpop.permute.xlu0 %1493  ;;  %v1889_v62 = vrot.slane %v1881_v1, %v3176_v51  ;;  %v1945_v28 = vrot.slane %v1937_v7, %v3166_v36  ;;  %v1928_v32 = vrot.slane %v1914_v16, %v3176_v51 }
 0x299   : > { %v3752_v60 = vcombine.high %v1873_v26, %v1905_v25  ;;  %v3754_v2 = vcombine.low %v1873_v26, %v1905_v25  ;;  %v1953_v58 = vcombine.low %v3735_v14, %v1488_v3  ;;  %v3763_v18 = vcombine.high %v1880_v45, %v1912_v34 }
 0x29a   : > { %v3765_v25 = vcombine.low %v1880_v45, %v1912_v34  ;;  %v1969_v0 = vcombine.low %v1490_v5, %v1494_v44  ;;  %v3773_v27 = vcombine.high %v1889_v62, %v1921_v11  ;;  %v3775_v34 = vcombine.low %v1889_v62, %v1921_v11 }
 0x29b   : > { %2157 = vperm.xlu0 %2826, %v3752_v60   ;;  %2154 = vperm.xlu1 %2829, %v3754_v2   ;;  %v1961_v26 = vrot.slane %v1953_v58, %v3166_v36  ;;  %v1896_v45 = vrot.slane %v1882_v35, %v3176_v51  ;;  %v1954_v1 = vcombine.high %v3735_v14, %v1488_v3 }
 0x29c   : > { %v1492_v46 = vpop.permute.xlu1 %1491  ;;  %v1977_v54 = vrot.slane %v1969_v0, %v3166_v36  ;;  %v1970_v19 = vcombine.high %v1490_v5, %v1494_v44 }
 0x29d   : > { %v2001_v58 = vcombine.low %v1945_v28, %v1961_v26  ;;  %v3786_v16 = vcombine.high %v1896_v45, %v1928_v32  ;;  %v3788_v11 = vcombine.low %v1896_v45, %v1928_v32  ;;  %v1968_v5 = vrot.slane %v1954_v1, %v3166_v36 }
 0x29e   : > { %v2002_v3 = vcombine.high %v1945_v28, %v1961_v26  ;;  %v1984_v44 = vrot.slane %v1970_v19, %v3166_v36 }
 0x29f   : > { %2163 = vperm.xlu0 %2826, %v3763_v18   ;;  %2160 = vperm.xlu1 %2829, %v3765_v25   ;;  %v2009_v35 = vrot.slane %v2001_v58, %v3176_v51 }
 0x2a0   : > { %v1496_v48 = vpop.permute.xlu1 %1495 }
 0x2a1   : > { %v1985_v29 = vcombine.low %v1492_v46, %v1496_v48  ;;  %v1986_v23 = vcombine.high %v1492_v46, %v1496_v48  ;;  %v1938_v48 = vcombine.high %v3707_v8, %v3721_v15 }
 0x2a3   : > { %v1993_v40 = vrot.slane %v1985_v29, %v3166_v36  ;;  %2169 = vperm.xlu0 %2826, %v3773_v27   ;;  %2166 = vperm.xlu1 %2829, %v3775_v34   ;;  %v2000_v62 = vrot.slane %v1986_v23, %v3166_v36  ;;  %v1952_v0 = vrot.slane %v1938_v48, %v3166_v36 }
 0x2a4   : > { %v2016_v23 = vrot.slane %v2002_v3, %v3176_v51 }
 0x2a5   : > { %v2033_v46 = vcombine.low %v1977_v54, %v1993_v40  ;;  %v2034_v7 = vcombine.high %v1977_v54, %v1993_v40  ;;  %v2049_v32 = vcombine.low %v1984_v44, %v2000_v62  ;;  %v2017_v58 = vcombine.low %v1952_v0, %v1968_v5 }
 0x2a6   : > { %v2050_v28 = vcombine.high %v1984_v44, %v2000_v62  ;;  %v2018_v40 = vcombine.high %v1952_v0, %v1968_v5  ;;  %v4229_v44 = vld [vmem:[#allocation11_spill] sm:$0xff] }
 0x2a7   : > { %v2041_v14 = vrot.slane %v2033_v46, %v3176_v51  ;;  %2175 = vperm.xlu0 %2826, %v3786_v16   ;;  %2172 = vperm.xlu1 %2829, %v3788_v11   ;;  %v2048_v29 = vrot.slane %v2034_v7, %v3176_v51  ;;  %v2057_v19 = vrot.slane %v2049_v32, %v3176_v51 }
 0x2a8   : > { %v2025_v45 = vrot.slane %v2017_v58, %v3176_v51  ;;  %v2064_v36 = vrot.slane %v2050_v28, %v3176_v51  ;;  %v2032_v46 = vrot.slane %v2018_v40, %v3176_v51 }
 0x2a9   : > { %v3796_v15 = vcombine.high %v2009_v35, %v2041_v14  ;;  %v2065_v8 = vcombine.low %v2009_v35, %v2041_v14  ;;  %v3803_v26 = vcombine.high %v2016_v23, %v2048_v29  ;;  %v3805_v54 = vcombine.low %v2016_v23, %v2048_v29 }
 0x2aa   : > { %v3811_v1 = vcombine.high %v2025_v45, %v2057_v19  ;;  %v2069_v48 = vcombine.low %v2025_v45, %v2057_v19  ;;  %v2072_v62 = vcombine.high %v2032_v46, %v2064_v36  ;;  %v3815_v7 = vcombine.low %v2032_v46, %v2064_v36 }
 0x2ab   : > { %2181 = vperm.xlu0 %2826, %v3796_v15   ;;  %2178 = vperm.xlu1 %2829, %v2065_v8   ;;  %v4225_v35 = vmov 1  }
 0x2af   : > { %2187 = vperm.xlu0 %2826, %v3803_v26   ;;  %2184 = vperm.xlu1 %2829, %v3805_v54  }
 0x2b3   : > { %2193 = vperm.xlu0 %2826, %v3811_v1   ;;  %2190 = vperm.xlu1 %2829, %v2069_v48  }
 0x2b7   : > { %2199 = vperm.xlu0 %2826, %v2072_v62   ;;  %2196 = vperm.xlu1 %2829, %v3815_v7  }
 0x2bb   : > { %2830 = vset.pattern.permute.xlu0 %v4225_v35  ;;  %2831 = vset.pattern.permute.xlu1 %v4225_v35 }
 0x2bc   : > { %1115 = vperm.xlu0 %2830, %v3186_v10   ;;  %2364 = vperm.xlu1 %2831, %v3657_v59  }
 0x2c0   : > { %1124 = vperm.xlu0 %2830, %v3213_v47   ;;  %2370 = vperm.xlu1 %2831, %v3661_v4  }
 0x2c1   : > { %v2110_v51 = vpop.permute.xlu1 %2109  ;;  %v2107_v10 = vpop.permute.xlu0 %2106 }
 0x2c4   : > { %1130 = vperm.xlu0 %2830, %v3228_v57   ;;  %2373 = vperm.xlu1 %2831, %v3663_v33  }
 0x2c5   : > { %v2113_v47 = vpop.permute.xlu1 %2112  ;;  %v3848_v57 = vpop.permute.xlu0 %2115 }
 0x2c8   : > { %1136 = vperm.xlu0 %2830, %v3240_v63   ;;  %2379 = vperm.xlu1 %2831, %v3671_v41  }
 0x2c9   : > { %v2119_v63 = vpop.permute.xlu1 %2118 }
 0x2cc   : > { %1142 = vperm.xlu0 %2830, %v3255_v37   ;;  %2385 = vperm.xlu1 %2831, %v3679_v24   ;;  %v3852_v37 = vpop.permute.xlu0 %2121  ;;  %v4226_v24 = vld [vmem:[#allocation8_spill] sm:$0xff] }
 0x2d0   : > { %1148 = vperm.xlu0 %2830, %v3267_v52   ;;  %2391 = vperm.xlu1 %2831, %v3700_v13   ;;  %v3856_v52 = vpop.permute.xlu1 %2124  ;;  %v2204_v13 = vrot.slane %v2107_v10, %v4226_v24 }
 0x2d4   : > { %1154 = vperm.xlu0 %2830, %v3282_v17   ;;  %2397 = vperm.xlu1 %2831, %v3712_v39   ;;  %v3858_v17 = vpop.permute.xlu0 %2127 }
 0x2d8   : > { %1160 = vperm.xlu0 %2830, %v3294_v6   ;;  %2403 = vperm.xlu1 %2831, %v3725_v50  }
 0x2dc   : > { %1166 = vperm.xlu0 %2830, %v3309_v43   ;;  %2415 = vperm.xlu1 %2831, %v3752_v60  }
 0x2e0   : > { %1172 = vperm.xlu0 %2830, %v3321_v9   ;;  %2436 = vperm.xlu1 %2831, %v2065_v8  }
 0x2e4   : > { %1178 = vperm.xlu0 %2830, %v3336_v12   ;;  %2421 = vperm.xlu1 %2831, %v3763_v18  }
 0x2e8   : > { %1184 = vperm.xlu0 %2830, %v3344_v22   ;;  %2424 = vperm.xlu1 %2831, %v3775_v34  }
 0x2ec   : > { %1190 = vperm.xlu0 %2830, %v3349_v38   ;;  %2406 = vperm.xlu1 %2831, %v3742_v31  }
 0x2f0   : > { %1196 = vperm.xlu0 %2830, %v3354_v49   ;;  %2448 = vperm.xlu1 %2831, %v2069_v48   ;;  %v4231_v48 = vld [vmem:[#allocation12_spill] sm:$0xff] }
 0x2f1   : > { %v2228_v46 = vrot.slane %v3852_v37, %v4231_v48 }
 0x2f4   : > { %1202 = vperm.xlu0 %2830, %v3359_v56   ;;  %2430 = vperm.xlu1 %2831, %v3788_v11  }
 0x2f8   : > { %2367 = vperm.xlu0 %2830, %v3655_v30   ;;  %2433 = vperm.xlu1 %2831, %v3786_v16   ;;  %v4228_v16 = vld [vmem:[#allocation10_spill] sm:$0xff] }
 0x2f9   : > { %v2218_v11 = vrot.slane %v3848_v57, %v4228_v16 }
 0x2fc   : > { %2376 = vperm.xlu0 %2830, %v3669_v42   ;;  %2457 = vperm.xlu1 %2831, %v2072_v62  }
 0x300   : > { %2382 = vperm.xlu0 %2830, %v3677_v53   ;;  %v2208_v53 = vrot.slane %v2110_v51, %v3450_v61 }
 0x302   : > { %v2209_v34 = vsel %vm941_vm0, %v2208_v53, %v2204_v13 }
 0x304   : > { %2388 = vperm.xlu0 %2830, %v3702_v21  }
 0x306   : > { %v2131_v6 = vpop.permute.xlu1 %2130  ;;  %v2134_v43 = vpop.permute.xlu0 %2133 }
 0x307   : > { %v2243_v21 = vrot.slane %v2131_v6, %v4226_v24  ;;  %v2247_v39 = vrot.slane %v2134_v43, %v3450_v61 }
 0x308   : > { %2394 = vperm.xlu0 %2830, %v3714_v20   ;;  %v4227_v20 = vld [vmem:[#allocation9_spill] sm:$0xff] }
 0x309   : > { %v2213_v50 = vrot.slane %v2113_v47, %v4227_v20  ;;  %v2248_v14 = vsel %vm941_vm0, %v2247_v39, %v2243_v21  ;;  %v4232_v47 = vld [vmem:[#allocation13_spill] sm:$0xff] }
 0x30a   : > { %v2137_v9 = vpop.permute.xlu1 %2136  ;;  %v2140_v12 = vpop.permute.xlu0 %2139 }
 0x30b   : > { %v2257_v5 = vrot.slane %v2140_v12, %v4228_v16  ;;  %v2214_v3 = vsel %vm948_vm1, %v2213_v50, %v2209_v34 }
 0x30c   : > { %2400 = vperm.xlu0 %2830, %v3727_v55   ;;  %v2252_v55 = vrot.slane %v2137_v9, %v4227_v20  ;;  %v2219_v40 = vsel %vm955_vm2, %v2218_v11, %v2214_v3 }
 0x30e   : > { %v2143_v22 = vpop.permute.xlu1 %2142  ;;  %v3863_v38 = vpop.permute.xlu0 %2145  ;;  %v2253_v8 = vsel %vm948_vm1, %v2252_v55, %v2248_v14 }
 0x30f   : > { %v2262_v0 = vrot.slane %v2143_v22, %v4229_v44  ;;  %v2258_v45 = vsel %vm955_vm2, %v2257_v5, %v2253_v8  ;;  %v2267_v35 = vrot.slane %v3863_v38, %v4231_v48  ;;  %v2233_v38 = vrot.slane %v3856_v52, %v4232_v47 }
 0x310   : > { %2412 = vperm.xlu0 %2830, %v3754_v2  }
 0x311   : > { %v2263_v62 = vsel %vm962_vm3, %v2262_v0, %v2258_v45 }
 0x312   : > { %v3866_v49 = vpop.permute.xlu1 %2148  ;;  %v3868_v56 = vpop.permute.xlu0 %2151 }
 0x313   : > { %v2272_v57 = vrot.slane %v3866_v49, %v4232_v47 }
 0x314   : > { %2418 = vperm.xlu0 %2830, %v3765_v25  }
 0x316   : > { %v2155_v30 = vpop.permute.xlu1 %2154  ;;  %v2158_v59 = vpop.permute.xlu0 %2157 }
 0x317   : > { %v2282_v2 = vrot.slane %v2155_v30, %v4226_v24  ;;  %v2286_v18 = vrot.slane %v2158_v59, %v3450_v61  ;;  %v2268_v59 = vsel %vm969_vm4, %v2267_v35, %v2263_v62  ;;  %v4234_v35 = vld [vmem:[#allocation15_spill] sm:$0xff] }
 0x318   : > { %2439 = vperm.xlu0 %2830, %v3796_v15   ;;  %v2223_v15 = vrot.slane %v2119_v63, %v4229_v44  ;;  %v2273_v53 = vsel %vm976_vm5, %v2272_v57, %v2268_v59 }
 0x31a   : > { %v2161_v4 = vpop.permute.xlu1 %2160  ;;  %v2164_v33 = vpop.permute.xlu0 %2163  ;;  %v2224_v36 = vsel %vm962_vm3, %v2223_v15, %v2219_v40 }
 0x31b   : > { %v2291_v25 = vrot.slane %v2161_v4, %v4227_v20  ;;  %v2296_v23 = vrot.slane %v2164_v33, %v4228_v16  ;;  %v2229_v30 = vsel %vm969_vm4, %v2228_v46, %v2224_v36  ;;  %v4233_v4 = vld [vmem:[#allocation14_spill] sm:$0xff] }
 0x31c   : > { %2442 = vperm.xlu0 %2830, %v3805_v54   ;;  %v4230_v54 = vld [vmem:[#allocation32_spill] sm:$0xff]  ;;  %v2277_v33 = vrot.slane %v3868_v56, %v4233_v4  ;;  %v2238_v52 = vrot.slane %v3858_v17, %v4233_v4  ;;  %v2234_v56 = vsel %vm976_vm5, %v2233_v38, %v2229_v30 }
 0x31e   : > { %v2167_v42 = vpop.permute.xlu1 %2166  ;;  %v2170_v41 = vpop.permute.xlu0 %2169  ;;  %v2239_v11 = vsel %vm983_vm6, %v2238_v52, %v2234_v56 }
 0x31f   : > { %v2301_v28 = vrot.slane %v2167_v42, %v4229_v44  ;;  %v2306_v6 = vrot.slane %v2170_v41, %v4231_v48 }
 0x320   : > { %2445 = vperm.xlu0 %2830, %v3803_v26  }
 0x322   : > { %v2173_v31 = vpop.permute.xlu1 %2172  ;;  %v2176_v60 = vpop.permute.xlu0 %2175 }
 0x323   : > { %v2311_v37 = vrot.slane %v2173_v31, %v4232_v47 }
 0x324   : > { %2427 = vperm.xlu0 %2830, %v3773_v27   ;;  %v2287_v27 = vsel %vm941_vm0, %v2286_v18, %v2282_v2 }
 0x325   : > { %v2292_v58 = vsel %vm948_vm1, %v2291_v25, %v2287_v27 }
 0x326   : > { %v2179_v29 = vpop.permute.xlu1 %2178  ;;  %v2182_v32 = vpop.permute.xlu0 %2181  ;;  %v2297_v63 = vsel %vm955_vm2, %v2296_v23, %v2292_v58 }
 0x327   : > { %v2321_v19 = vrot.slane %v2179_v29, %v4226_v24  ;;  %v2325_v26 = vrot.slane %v2182_v32, %v3450_v61  ;;  %v2302_v9 = vsel %vm962_vm3, %v2301_v28, %v2297_v63 }
 0x328   : > { %2409 = vperm.xlu0 %2830, %v4230_v54   ;;  %v2307_v13 = vsel %vm969_vm4, %v2306_v6, %v2302_v9 }
 0x329   : > { %v2326_v12 = vsel %vm941_vm0, %v2325_v26, %v2321_v19  ;;  %v2312_v39 = vsel %vm976_vm5, %v2311_v37, %v2307_v13 }
 0x32a   : > { %v2185_v51 = vpop.permute.xlu1 %2184  ;;  %v2188_v10 = vpop.permute.xlu0 %2187 }
 0x32b   : > { %v2330_v43 = vrot.slane %v2185_v51, %v4227_v20  ;;  %v2335_v22 = vrot.slane %v2188_v10, %v4228_v16  ;;  %v1210_v51 = vrot.slane %v4234_v35, %v4226_v24  ;;  %v4244_v35 = vld [vmem:[#allocation18_spill] sm:$0xff] }
 0x32c   : > { %2451 = vperm.xlu0 %2830, %v3811_v1   ;;  %v2316_v1 = vrot.slane %v2176_v60, %v4233_v4  ;;  %v2278_v60 = vsel %vm983_vm6, %v2277_v33, %v2273_v53  ;;  %v4238_v33 = vld [vmem:[#allocation17_spill] sm:$0xff] }
 0x32d   : > { %v2331_v49 = vsel %vm948_vm1, %v2330_v43, %v2326_v12  ;;  %v4235_v43 = vld [vmem:[#allocation20_spill] sm:$0xff] }
 0x32e   : > { %v2191_v42 = vpop.permute.xlu1 %2190  ;;  %v2194_v41 = vpop.permute.xlu0 %2193  ;;  %v2336_v50 = vsel %vm955_vm2, %v2335_v22, %v2331_v49  ;;  %v2317_v25 = vsel %vm983_vm6, %v2316_v1, %v2312_v39  ;;  %v1253_v9 = vrot.slane %v4235_v43, %v3450_v61  ;;  %v4236_v22 = vld [vmem:[#allocation16_spill] sm:$0xff]  ;;  %v4239_v39 = vld [vmem:[#allocation21_spill] sm:$0xff] }
 0x32f   : > { %v2340_v21 = vrot.slane %v2191_v42, %v4229_v44  ;;  %v2345_v55 = vrot.slane %v2194_v41, %v4231_v48  ;;  %v1219_v38 = vrot.slane %v4236_v22, %v4227_v20  ;;  %v4237_v49 = vld [vmem:[#allocation24_spill] sm:$0xff]  ;;  %v1224_v42 = vrot.slane %v4238_v33, %v4228_v16 }
 0x330   : > { %2454 = vperm.xlu0 %2830, %v3815_v7   ;;  %v2357_v7 = vsel %vm1102_vm7, %v2278_v60, %v2239_v11  ;;  %v1292_v30 = vrot.slane %v4237_v49, %v3450_v61  ;;  %v4240_v60 = vld [vmem:[#allocation25_spill] sm:$0xff] }
 0x331   : > { %v2341_v31 = vsel %vm962_vm3, %v2340_v21, %v2336_v50  ;;  %v2358_v3 = vsel %vm1104_vm8, %v2317_v25, %v2357_v7  ;;  %v1263_v50 = vrot.slane %v4239_v39, %v4228_v16  ;;  %v4241_v25 = vld [vmem:[#allocation28_spill] sm:$0xff] }
 0x332   : > { %v2197_v2 = vpop.permute.xlu1 %2196  ;;  %v2200_v18 = vpop.permute.xlu0 %2199  ;;  %v2346_v14 = vsel %vm969_vm4, %v2345_v55, %v2341_v31 }
 0x333   : > { %v2350_v17 = vrot.slane %v2197_v2, %v4232_v47  ;;  %v2355_v34 = vrot.slane %v2200_v18, %v4233_v4  ;;  %v1302_v2 = vrot.slane %v4240_v60, %v4228_v16 }
 0x335   : > { %v2351_v5 = vsel %vm976_vm5, %v2350_v17, %v2346_v14  ;;  %v1331_v17 = vrot.slane %v4241_v25, %v3450_v61 }
 0x336   : > { %v2356_v15 = vsel %vm983_vm6, %v2355_v34, %v2351_v5 }
 0x337   : > { %v2359_v8 = vsel %vm1106_vm9, %v2356_v15, %v2358_v3  ;;  %v1116_v0 = vpop.permute.xlu0 %1115  ;;  %v3952_v58 = vpop.permute.xlu1 %2364 }
 0x338   : > { %2739 = vst.msk [vmem:[%s3573_s3 + $0x8] sm:$0xf] %vm1109_vm10, %v2359_v8  ;;  %v1214_v62 = vrot.slane %v1116_v0, %v3450_v61  ;;  %v4242_v0 = vld [vmem:[#allocation22_spill] sm:$0xff] }
 0x33a   : > { %v1215_v37 = vsel %vm941_vm0, %v1214_v62, %v1210_v51  ;;  %v1234_v51 = vrot.slane %v4244_v35, %v4231_v48 }
 0x33b   : > { %v1125_v29 = vpop.permute.xlu0 %1124  ;;  %v3954_v26 = vpop.permute.xlu1 %2370  ;;  %v1220_v13 = vsel %vm948_vm1, %v1219_v38, %v1215_v37 }
 0x33c   : > { %v1229_v18 = vrot.slane %v1125_v29, %v4229_v44  ;;  %v1225_v34 = vsel %vm955_vm2, %v1224_v42, %v1220_v13  ;;  %v1273_v29 = vrot.slane %v4242_v0, %v4231_v48  ;;  %v4248_v13 = vld [vmem:[#allocation19_spill] sm:$0xff] }
 0x33f   : > { %v3950_v32 = vpop.permute.xlu0 %1130  ;;  %v3956_v40 = vpop.permute.xlu1 %2373 }
 0x343   : > { %v1137_v27 = vpop.permute.xlu0 %1136  ;;  %v3958_v46 = vpop.permute.xlu1 %2379 }
 0x344   : > { %v1249_v10 = vrot.slane %v1137_v27, %v4226_v24 }
 0x346   : > { %v1254_v41 = vsel %vm941_vm0, %v1253_v9, %v1249_v10  ;;  %v4245_v10 = vld [vmem:[#allocation29_spill] sm:$0xff] }
 0x347   : > { %v1143_v23 = vpop.permute.xlu0 %1142  ;;  %v3974_v59 = vpop.permute.xlu1 %2385 }
 0x348   : > { %v1258_v63 = vrot.slane %v1143_v23, %v4227_v20 }
 0x34a   : > { %v1259_v1 = vsel %vm948_vm1, %v1258_v63, %v1254_v41  ;;  %v1341_v63 = vrot.slane %v4245_v10, %v4228_v16 }
 0x34b   : > { %v1149_v28 = vpop.permute.xlu0 %1148  ;;  %v1264_v11 = vsel %vm955_vm2, %v1263_v50, %v1259_v1  ;;  %v3995_v7 = vpop.permute.xlu1 %2391  ;;  %v1244_v1 = vrot.slane %v4248_v13, %v4233_v4 }
 0x34c   : > { %v1268_v21 = vrot.slane %v1149_v28, %v4229_v44 }
 0x34e   : > { %v1269_v5 = vsel %vm962_vm3, %v1268_v21, %v1264_v11  ;;  %v4249_v21 = vld [vmem:[#allocation30_spill] sm:$0xff] }
 0x34f   : > { %v1155_v19 = vpop.permute.xlu0 %1154  ;;  %v2398_v41 = vpop.permute.xlu1 %2397 }
 0x350   : > { %v1278_v3 = vrot.slane %v1155_v19, %v4232_v47  ;;  %v1239_v19 = vrot.slane %v3950_v32, %v4232_v47 }
 0x353   : > { %v1161_v54 = vpop.permute.xlu0 %1160 }
 0x354   : > { %v1288_v6 = vrot.slane %v1161_v54, %v4226_v24  ;;  %v4243_v54 = vld [vmem:[#allocation26_spill] sm:$0xff] }
 0x356   : > { %v1293_v52 = vsel %vm941_vm0, %v1292_v30, %v1288_v6  ;;  %v4247_v30 = vld [vmem:[#allocation27_spill] sm:$0xff] }
 0x357   : > { %v1167_v45 = vpop.permute.xlu0 %1166  ;;  %v1322_v33 = vrot.slane %v4247_v30, %v4233_v4  ;;  %v2476_v30 = vrot.slane %v3956_v40, %v4228_v16 }
 0x358   : > { %v1297_v12 = vrot.slane %v1167_v45, %v4227_v20  ;;  %v1312_v45 = vrot.slane %v4243_v54, %v4231_v48 }
 0x35a   : > { %v1298_v55 = vsel %vm948_vm1, %v1297_v12, %v1293_v52  ;;  %v4246_v12 = vld [vmem:[#allocation23_spill] sm:$0xff]  ;;  %v1351_v52 = vrot.slane %v4249_v21, %v4231_v48 }
 0x35b   : > { %v1173_v36 = vpop.permute.xlu0 %1172  ;;  %v1303_v15 = vsel %vm955_vm2, %v1302_v2, %v1298_v55  ;;  %v1283_v32 = vrot.slane %v4246_v12, %v4233_v4  ;;  %v2505_v12 = vrot.slane %v3995_v7, %v3450_v61  ;;  %v2515_v7 = vrot.slane %v2398_v41, %v4228_v16 }
 0x35c   : > { %v1307_v56 = vrot.slane %v1173_v36, %v4229_v44  ;;  %v1230_v36 = vsel %vm962_vm3, %v1229_v18, %v1225_v34 }
 0x35d   : > { %v1235_v22 = vsel %vm969_vm4, %v1234_v51, %v1230_v36 }
 0x35e   : > { %v1308_v27 = vsel %vm962_vm3, %v1307_v56, %v1303_v15  ;;  %v1240_v42 = vsel %vm976_vm5, %v1239_v19, %v1235_v22 }
 0x35f   : > { %v1179_v57 = vpop.permute.xlu0 %1178  ;;  %v1313_v9 = vsel %vm969_vm4, %v1312_v45, %v1308_v27  ;;  %v1245_v2 = vsel %vm983_vm6, %v1244_v1, %v1240_v42 }
 0x360   : > { %v1317_v23 = vrot.slane %v1179_v57, %v4232_v47  ;;  %v1274_v57 = vsel %vm969_vm4, %v1273_v29, %v1269_v5  ;;  %v2404_v5 = vpop.permute.xlu1 %2403 }
 0x361   : > { %v1279_v43 = vsel %vm976_vm5, %v1278_v3, %v1274_v57  ;;  %v2525_v41 = vrot.slane %v2404_v5, %v4231_v48 }
 0x362   : > { %v1318_v38 = vsel %vm976_vm5, %v1317_v23, %v1313_v9  ;;  %v1284_v39 = vsel %vm983_vm6, %v1283_v32, %v1279_v43 }
 0x363   : > { %v1185_v53 = vpop.permute.xlu0 %1184  ;;  %v1323_v55 = vsel %vm983_vm6, %v1322_v33, %v1318_v38  ;;  %v1363_v25 = vsel %vm1102_vm7, %v1284_v39, %v1245_v2 }
 0x364   : > { %v1327_v31 = vrot.slane %v1185_v53, %v4226_v24  ;;  %v1364_v34 = vsel %vm1104_vm8, %v1323_v55, %v1363_v25 }
 0x366   : > { %v1332_v28 = vsel %vm941_vm0, %v1331_v17, %v1327_v31  ;;  %v4250_v31 = vld [vmem:[#allocation31_spill] sm:$0xff] }
 0x367   : > { %v1191_v14 = vpop.permute.xlu0 %1190  ;;  %v1361_v60 = vrot.slane %v4250_v31, %v4233_v4 }
 0x368   : > { %v1336_v8 = vrot.slane %v1191_v14, %v4227_v20 }
 0x36a   : > { %v1337_v62 = vsel %vm948_vm1, %v1336_v8, %v1332_v28  ;;  %v2416_v8 = vpop.permute.xlu1 %2415 }
 0x36b   : > { %v1197_v6 = vpop.permute.xlu0 %1196  ;;  %v1342_v49 = vsel %vm955_vm2, %v1341_v63, %v1337_v62  ;;  %v2462_v63 = vrot.slane %v3952_v58, %v4226_v24  ;;  %v2544_v33 = vrot.slane %v2416_v8, %v3450_v61 }
 0x36c   : > { %v1346_v37 = vrot.slane %v1197_v6, %v4229_v44 }
 0x36e   : > { %v1347_v53 = vsel %vm962_vm3, %v1346_v37, %v1342_v49  ;;  %v2437_v27 = vpop.permute.xlu1 %2436  ;;  %v2471_v37 = vrot.slane %v3954_v26, %v4227_v20 }
 0x36f   : > { %v1203_v50 = vpop.permute.xlu0 %1202  ;;  %v1352_v18 = vsel %vm969_vm4, %v1351_v52, %v1347_v53  ;;  %v2579_v31 = vrot.slane %v2437_v27, %v4226_v24 }
 0x370   : > { %v1356_v56 = vrot.slane %v1203_v50, %v4232_v47  ;;  %v2486_v50 = vrot.slane %v3958_v46, %v4231_v48 }
 0x372   : > { %v1357_v17 = vsel %vm976_vm5, %v1356_v56, %v1352_v18  ;;  %v2422_v28 = vpop.permute.xlu1 %2421 }
 0x373   : > { %v1362_v11 = vsel %vm983_vm6, %v1361_v60, %v1357_v17  ;;  %v2368_v14 = vpop.permute.xlu0 %2367  ;;  %v2554_v55 = vrot.slane %v2422_v28, %v4228_v16 }
 0x374   : > { %v1365_v3 = vsel %vm1106_vm9, %v1362_v11, %v1364_v34  ;;  %v2466_v51 = vrot.slane %v2368_v14, %v3450_v61 }
 0x375   : > { %2738 = vst.msk [vmem:[%s3573_s3 + $0x4] sm:$0xf] %vm1109_vm10, %v1365_v3 }
 0x376   : > { %v2425_v36 = vpop.permute.xlu1 %2424  ;;  %v2467_v43 = vsel %vm941_vm0, %v2466_v51, %v2462_v63 }
 0x377   : > { %v2377_v15 = vpop.permute.xlu0 %2376  ;;  %v2472_v38 = vsel %vm948_vm1, %v2471_v37, %v2467_v43  ;;  %v2559_v14 = vrot.slane %v2425_v36, %v4229_v44 }
 0x378   : > { %v2481_v13 = vrot.slane %v2377_v15, %v4229_v44  ;;  %v2477_v21 = vsel %vm955_vm2, %v2476_v30, %v2472_v38  ;;  %v2496_v15 = vrot.slane %v3974_v59, %v4233_v4 }
 0x37a   : > { %v2407_v62 = vpop.permute.xlu1 %2406  ;;  %v2482_v60 = vsel %vm962_vm3, %v2481_v13, %v2477_v21 }
 0x37b   : > { %v2383_v0 = vpop.permute.xlu0 %2382  ;;  %v2487_v8 = vsel %vm969_vm4, %v2486_v50, %v2482_v60 }
 0x37c   : > { %v2491_v17 = vrot.slane %v2383_v0, %v4232_v47 }
 0x37e   : > { %v4050_v57 = vpop.permute.xlu1 %2448  ;;  %v2492_v27 = vsel %vm976_vm5, %v2491_v17, %v2487_v8 }
 0x37f   : > { %v2389_v29 = vpop.permute.xlu0 %2388 }
 0x380   : > { %v2501_v6 = vrot.slane %v2389_v29, %v4226_v24 }
 0x382   : > { %v2506_v58 = vsel %vm941_vm0, %v2505_v12, %v2501_v6  ;;  %v2431_v42 = vpop.permute.xlu1 %2430 }
 0x383   : > { %v2395_v23 = vpop.permute.xlu0 %2394 }
 0x384   : > { %v2510_v9 = vrot.slane %v2395_v23, %v4227_v20 }
 0x386   : > { %v2511_v26 = vsel %vm948_vm1, %v2510_v9, %v2506_v58  ;;  %v2434_v25 = vpop.permute.xlu1 %2433 }
 0x387   : > { %v2401_v54 = vpop.permute.xlu0 %2400  ;;  %v2516_v39 = vsel %vm955_vm2, %v2515_v7, %v2511_v26  ;;  %v2574_v63 = vrot.slane %v2434_v25, %v4233_v4 }
 0x388   : > { %v2520_v53 = vrot.slane %v2401_v54, %v4229_v44  ;;  %v2569_v54 = vrot.slane %v2431_v42, %v4232_v47 }
 0x38a   : > { %v2521_v56 = vsel %vm962_vm3, %v2520_v53, %v2516_v39 }
 0x38b   : > { %v2413_v45 = vpop.permute.xlu0 %2412  ;;  %v2526_v5 = vsel %vm969_vm4, %v2525_v41, %v2521_v56 }
 0x38c   : > { %v2540_v22 = vrot.slane %v2413_v45, %v4226_v24 }
 0x38e   : > { %v2545_v52 = vsel %vm941_vm0, %v2544_v33, %v2540_v22 }
 0x38f   : > { %v2419_v19 = vpop.permute.xlu0 %2418 }
 0x390   : > { %v2549_v49 = vrot.slane %v2419_v19, %v4227_v20  ;;  %v2598_v19 = vrot.slane %v4050_v57, %v4229_v44 }
 0x392   : > { %v2550_v40 = vsel %vm948_vm1, %v2549_v49, %v2545_v52 }
 0x393   : > { %v2440_v35 = vpop.permute.xlu0 %2439  ;;  %v2555_v34 = vsel %vm955_vm2, %v2554_v55, %v2550_v40 }
 0x394   : > { %v2583_v2 = vrot.slane %v2440_v35, %v3450_v61  ;;  %v2530_v61 = vrot.slane %v2407_v62, %v4232_v47  ;;  %v2458_v62 = vpop.permute.xlu1 %2457  ;;  %v2497_v35 = vsel %vm983_vm6, %v2496_v15, %v2492_v27 }
 0x395   : > { %v2613_v44 = vrot.slane %v2458_v62, %v4233_v4 }
 0x396   : > { %v2584_v0 = vsel %vm941_vm0, %v2583_v2, %v2579_v31  ;;  %v2531_v28 = vsel %vm976_vm5, %v2530_v61, %v2526_v5 }
 0x397   : > { %v2443_v10 = vpop.permute.xlu0 %2442 }
 0x398   : > { %v2588_v46 = vrot.slane %v2443_v10, %v4227_v20  ;;  %v2560_v20 = vsel %vm962_vm3, %v2559_v14, %v2555_v34 }
 0x39b   : > { %v2446_v32 = vpop.permute.xlu0 %2445 }
 0x39c   : > { %v2593_v24 = vrot.slane %v2446_v32, %v4228_v16  ;;  %v2589_v16 = vsel %vm948_vm1, %v2588_v46, %v2584_v0 }
 0x39e   : > { %v2594_v59 = vsel %vm955_vm2, %v2593_v24, %v2589_v16 }
 0x39f   : > { %v2428_v1 = vpop.permute.xlu0 %2427 }
 0x3a0   : > { %v2564_v11 = vrot.slane %v2428_v1, %v4231_v48 }
 0x3a2   : > { %v2565_v23 = vsel %vm969_vm4, %v2564_v11, %v2560_v20 }
 0x3a3   : > { %v2410_v18 = vpop.permute.xlu0 %2409  ;;  %v2570_v51 = vsel %vm976_vm5, %v2569_v54, %v2565_v23 }
 0x3a4   : > { %v2535_v3 = vrot.slane %v2410_v18, %v4233_v4  ;;  %v2575_v9 = vsel %vm983_vm6, %v2574_v63, %v2570_v51 }
 0x3a6   : > { %v2536_v45 = vsel %vm983_vm6, %v2535_v3, %v2531_v28 }
 0x3a7   : > { %v2452_v29 = vpop.permute.xlu0 %2451  ;;  %v2615_v6 = vsel %vm1102_vm7, %v2536_v45, %v2497_v35 }
 0x3a8   : > { %v2603_v36 = vrot.slane %v2452_v29, %v4231_v48  ;;  %v2599_v48 = vsel %vm962_vm3, %v2598_v19, %v2594_v59 }
 0x3aa   : > { %v2604_v57 = vsel %vm969_vm4, %v2603_v36, %v2599_v48 }
 0x3ab   : > { %v2455_v10 = vpop.permute.xlu0 %2454 }
 0x3ac   : > { %v2608_v43 = vrot.slane %v2455_v10, %v4232_v47  ;;  %v2616_v47 = vsel %vm1104_vm8, %v2575_v9, %v2615_v6 }
 0x3ae   : > { %v2609_v37 = vsel %vm976_vm5, %v2608_v43, %v2604_v57 }
 0x3af   : > { %v2614_v4 = vsel %vm983_vm6, %v2613_v44, %v2609_v37 }
 0x3b0   : > { %v2617_v12 = vsel %vm1106_vm9, %v2614_v4, %v2616_v47 }
 0x3b1   : > { %2740 = vst.msk [vmem:[%s3573_s3 + $0xc] sm:$0xf] %vm1109_vm10, %v2617_v12 }
 0x3b2   : > { %2873 = shalt.err (!%p2870_p6)
}
 0x3b3   : > { %s2874_s18 = scalar_lea.hbm %s4121_s13, 256  ;;  %s2878_s27 = scalar_lea.hbm %s4177_s1, 512 }
 0x3b4   : > { %p2875_p7 = scmp.ne.s32.totalorder %s4121_s13, %s2874_s18  ;;  %p2879_p13 = scmp.lt.s32.totalorder %s4121_s13, %s4177_s1 }
 0x3b5   : > { %p2880_p2 = scmp.lt.s32.totalorder %s2878_s27, %s2874_s18 }
 0x3b6   : > { %p2876_p10 = pnand %p2875_p7, %p3021_p9 }
 0x3b7   : > { %p2881_p8 = por %p2880_p2, %p2879_p13 }
 0x3b8   : > { %p2877_p4 = pneg %p2876_p10 }
 0x3ba   : > { %p2882_p12 = pnand %p2881_p8, %p2877_p4 }
 0x3bc   : > { %2885 = shalt.err (!%p2882_p12)
}
 0x3bd   : > { %s2958_s30 = smov 64   ;;  %s2959_s2 = smov 4  }
 0x3be   : > { %2750 = dma.vmem_to_hbm [thread:$0]  (%p3021_p9), %s4123_s5, 256, %s4121_s13, %s2622_s15, %s2958_s30, %s2958_s30, %s2959_s2  }
 0x3bf PF: > { %s2652_s3 = sand.u32 1, %s2920_s6   ;;  %p4251_p0 = scmp.ge.s32.totalorder %s2940_s11, 2 }
 0x3c0   : > { %s2653_s4 = scalar_lea.sflag [#allocation4], %s2652_s3 }
 0x3c1   : > { %p2757_p1 = pnand %p4251_p0, %p3028_p11 }
 0x3c3   : > { %p2758_p3 = pneg %p2757_p1 }
 0x3c5   : > { %2915 = dma.done.wait (%p2758_p3), %s2653_s4, 256  }
 0x3c6   : > { %2917 = vsyncadd (%p2758_p3), %s2653_s4, 4294967040  ;;  %s17_s11 = sadd.s32 1, %s2940_s11   ;;  %s4252_s6 = smov %s2924_s7 }
 0x3c7   : > { %p14_p5 = scmp.ge.s32.totalorder %s17_s11, 4   ;;  %s4253_s7 = smov %s2928_s8 }
 0x3c8   : > { %s4254_s8 = smov %s3026_s20  ;;  %s4255_s9 = smov %s2936_s10 }
 0x3c9   : > { %s4256_s10 = smov %s4258_s14  ;;  %16 = sbr.rel (!%p14_p5) target bundleno = 6 (0x6), region = 72 }
 0x3ce   :  { %2658 = vsyncpa [#allocation3], 1 }
 0x3cf   :  { %2660 = vsyncpa [#allocation3 + $0x1], 1 }
 0x3d0   :  { %2661 = vsyncpa [#allocation4], 1 }
 0x3d1   :  { %2663 = vsyncpa [#allocation4 + $0x1], 1 }

</bundles_post_ra>
